<compile_context>
chip_gen: v7x
topology: tpu7x:2x2x1
jax: 0.10.0
libtpu: 0.0.40
codegen_flags: <defaults>
</compile_context>

<pallas_src>
import numpy as np
import jax
import jax.numpy as jnp
from jax import lax
from jax.experimental import pallas as pl
from jax.experimental.pallas import tpu as pltpu


def _tap_masks(D, H, W):
    """(27, D*H*W) f32 validity masks: 1 where tap (kd,kh,kw) reads in-bounds, else 0."""
    d = np.arange(D)[:, None, None]
    h = np.arange(H)[None, :, None]
    w = np.arange(W)[None, None, :]
    rows = []
    for kd in range(3):
        for kh in range(3):
            for kw in range(3):
                valid = ((d + kd - 1 >= 0) & (d + kd - 1 < D) &
                         (h + kh - 1 >= 0) & (h + kh - 1 < H) &
                         (w + kw - 1 >= 0) & (w + kw - 1 < W))
                rows.append(valid.reshape(-1))
    return jnp.asarray(np.stack(rows).astype(np.float32))


def conv3d_forward(x_ncdhw, weight_oidhw, bias, gamma, beta, *, bn=True, eps=1e-5):
    """Equivalent of Conv3D.forward (stride=1, training-mode BN). x: NCDHW -> out: NCDHW."""
    N, Cin, D, H, W = x_ncdhw.shape
    Cout = weight_oidhw.shape[0]
    HW = H * W
    DHW = D * H * W
    K = 27 * Cin
    KP = ((K + 127) // 128) * 128          # pad contraction dim to a lane multiple

    if bn:
        # Training-mode batch statistics in a single pass over x (mean of x and x*x).
        xf = x_ncdhw.astype(jnp.float32)
        mean = jnp.mean(xf, axis=(0, 2, 3, 4))
        mean_sq = jnp.mean(xf * xf, axis=(0, 2, 3, 4))
        var = jnp.maximum(mean_sq - mean * mean, 0.0)   # clamp: E[x^2]-mean^2 can go slightly <0
        scale = gamma.astype(jnp.float32) / jnp.sqrt(var + eps)
        shift = beta.astype(jnp.float32) - mean * scale
    else:
        scale = jnp.ones((Cin,), jnp.float32)
        shift = jnp.zeros((Cin,), jnp.float32)
    # TODO(synk): running_mean/running_var buffer updates (training side effect) are not
    #             modeled; they do not affect this forward's output.

    # NCDHW consumed directly: pure metadata reshape + bf16 cast (halves the kernel HBM read).
    x_flat = x_ncdhw.reshape(N, Cin, DHW).astype(jnp.bfloat16)

    # Weight as (Cout, K) with K ordered (kd, kh, kw, ci), zero-padded to KP; bf16 for the MXU.
    w2 = jnp.transpose(weight_oidhw, (0, 2, 3, 4, 1)).reshape(Cout, K)
    w2 = jnp.pad(w2, ((0, 0), (0, KP - K))).astype(jnp.bfloat16)

    masks = _tap_masks(D, H, W)                          # (27, DHW) f32, compile-time constant

    def kernel(x_ref, scale_ref, shift_ref, mask_ref, w_ref, b_ref, o_ref, slab_ref):
        # x_ref     : (1, Cin, DHW) bf16      scale/shift_ref : (Cin, 1) f32
        # mask_ref  : (27, DHW) f32           w_ref : (Cout, KP) bf16    b_ref : (Cout, 1) f32
        # o_ref     : (1, Cout, DHW) f32      slab_ref : (KP, DHW) bf16 scratch

        # BN + ReLU in f32 on the VPU (lane-dense, whole row block lives in a few vregs).
        y = x_ref[0].astype(jnp.float32)
        y = jnp.maximum(y * scale_ref[...] + shift_ref[...], 0.0)        # (Cin, DHW)

        # Zero only the K-padding rows (must be non-garbage: NaN * 0-weight would poison acc);
        # the valid rows are fully overwritten below every step.
        if KP > K:
            slab_ref[K:, :] = jnp.zeros((KP - K, DHW), slab_ref.dtype)

        # im2col via static lane rotations + boundary masks: 27 lane-dense row-block stores.
        t = 0
        for kd in range(3):
            for kh in range(3):
                for kw in range(3):
                    off = (kd - 1) * HW + (kh - 1) * W + (kw - 1)
                    sh = (-off) % DHW                     # roll so slab[p] = y[p + off]
                    rolled = y if sh == 0 else pltpu.roll(y, sh, 1)
                    tap = rolled * mask_ref[t:t + 1, :]   # zero the wrapped/out-of-bounds lanes
                    slab_ref[t * Cin:(t + 1) * Cin, :] = tap.astype(slab_ref.dtype)
                    t += 1

        # One big-K MXU matmul: (Cout, KP) . (KP, DHW), bf16 inputs, f32 accumulation.
        out = jnp.dot(w_ref[...], slab_ref[...], preferred_element_type=jnp.float32)
        o_ref[0, :, :] = (out + b_ref[...]).astype(o_ref.dtype)

    grid_spec = pltpu.PrefetchScalarGridSpec(
        num_scalar_prefetch=0,
        grid=(N,),
        in_specs=[
            pl.BlockSpec((1, Cin, DHW), lambda n: (n, 0, 0)),
            pl.BlockSpec((Cin, 1), lambda n: (0, 0)),
            pl.BlockSpec((Cin, 1), lambda n: (0, 0)),
            pl.BlockSpec((27, DHW), lambda n: (0, 0)),
            pl.BlockSpec((Cout, KP), lambda n: (0, 0)),
            pl.BlockSpec((Cout, 1), lambda n: (0, 0)),
        ],
        out_specs=pl.BlockSpec((1, Cout, DHW), lambda n: (n, 0, 0)),
        scratch_shapes=[pltpu.VMEM((KP, DHW), jnp.bfloat16)],
    )

    out_flat = pl.pallas_call(
        kernel,
        out_shape=jax.ShapeDtypeStruct((N, Cout, DHW), jnp.float32),
        grid_spec=grid_spec,
        compiler_params=pltpu.CompilerParams(
            dimension_semantics=("parallel",),
            vmem_limit_bytes=32 * 1024 * 1024),
    )(
        x_flat,
        scale.reshape(Cin, 1).astype(jnp.float32),
        shift.reshape(Cin, 1).astype(jnp.float32),
        masks,
        w2,
        bias.reshape(Cout, 1).astype(jnp.float32),
    )

    # (N, Cout, D*H*W) is already NCDHW order: pure reshape, no transpose.
    return out_flat.reshape(N, Cout, D, H, W)


def _reference_forward(x_ncdhw, weight_oidhw, bias, gamma, beta, *, bn=True, eps=1e-5):
    """Pure-JAX reference mirroring the PyTorch module (training-mode BN)."""
    h = x_ncdhw
    if bn:
        mean = jnp.mean(h, axis=(0, 2, 3, 4), keepdims=True)
        var = jnp.mean((h - mean) ** 2, axis=(0, 2, 3, 4), keepdims=True)
        h = (h - mean) / jnp.sqrt(var + eps)
        h = h * gamma[None, :, None, None, None] + beta[None, :, None, None, None]
    h = jnp.maximum(h, 0.0)
    out = lax.conv_general_dilated(
        h, weight_oidhw, window_strides=(1, 1, 1),
        padding=((1, 1), (1, 1), (1, 1)),
        dimension_numbers=("NCDHW", "OIDHW", "NCDHW"))
    return out + bias[None, :, None, None, None]


if __name__ == "__main__":
    # Small deterministic setup: batch=2, in_dim=4, out_dim=8, spatial D=H=W=8.
    N, Cin, Cout, D, H, W = 2, 4, 8, 8, 8, 8
    key = jax.random.PRNGKey(0)
    kx, kw, kb = jax.random.split(key, 3)

    x = jax.random.normal(kx, (N, Cin, D, H, W), dtype=jnp.float32)

    fan_in = Cin * 3 * 3 * 3
    bound = 1.0 / (fan_in ** 0.5)
    weight = jax.random.uniform(kw, (Cout, Cin, 3, 3, 3), jnp.float32, -bound, bound)
    bias = jax.random.uniform(kb, (Cout,), jnp.float32, -bound, bound)
    gamma = jnp.ones((Cin,), jnp.float32)
    beta = jnp.zeros((Cin,), jnp.float32)

    fwd = jax.jit(conv3d_forward)
    out = jax.block_until_ready(fwd(x, weight, bias, gamma, beta))
    ref = jax.block_until_ready(_reference_forward(x, weight, bias, gamma, beta))

    assert out.shape == (N, Cout, D, H, W), out.shape
    err = float(jnp.max(jnp.abs(out - ref)))
    # Activations and weights are bf16 on the MXU (f32 accumulation); typical max abs error is
    # ~1e-2, so allow 1e-1 of headroom against the f32 reference conv.
    assert err < 1e-1, f"max abs error too large: {err}"

    print("KERNEL_OK")
</pallas_src>

<mosaic_0001>
module attributes {stable_mosaic.version = 11 : i64} {
  func.func @kernel(%arg0: i32, %arg1: memref<1x4x512xbf16, #tpu.memory_space<vmem>>, %arg2: memref<4x1xf32, #tpu.memory_space<vmem>>, %arg3: memref<4x1xf32, #tpu.memory_space<vmem>>, %arg4: memref<27x512xf32, #tpu.memory_space<vmem>>, %arg5: memref<8x128xbf16, #tpu.memory_space<vmem>>, %arg6: memref<8x1xf32, #tpu.memory_space<vmem>>, %arg7: memref<1x8x512xf32, #tpu.memory_space<vmem>>, %arg8: memref<128x512xbf16, #tpu.memory_space<vmem>>) attributes {dimension_semantics = [#tpu.dimension_semantics<parallel>], iteration_bounds = array<i64: 2>, scalar_prefetch = 0 : i64, scratch_operands = 1 : i64, tpu.core_type = #tpu.core_type<tc>, window_params = [{transform_indices = @transform_0, window_bounds = array<i64: 1, 4, 512>}, {pipeline_mode = #tpu.pipeline_mode<synchronous>, transform_indices = @transform_1, window_bounds = array<i64: 4, 1>}, {pipeline_mode = #tpu.pipeline_mode<synchronous>, transform_indices = @transform_2, window_bounds = array<i64: 4, 1>}, {pipeline_mode = #tpu.pipeline_mode<synchronous>, transform_indices = @transform_3, window_bounds = array<i64: 27, 512>}, {pipeline_mode = #tpu.pipeline_mode<synchronous>, transform_indices = @transform_4, window_bounds = array<i64: 8, 128>}, {pipeline_mode = #tpu.pipeline_mode<synchronous>, transform_indices = @transform_5, window_bounds = array<i64: 8, 1>}, {transform_indices = @transform_6, window_bounds = array<i64: 1, 8, 512>}]} {
    %c0 = arith.constant 0 : index
    %c0_0 = arith.constant 0 : index
    %c0_1 = arith.constant 0 : index
    %0 = vector.load %arg1[%c0, %c0_0, %c0_1] : memref<1x4x512xbf16, #tpu.memory_space<vmem>>, vector<1x4x512xbf16>
    %1 = vector.shape_cast %0 : vector<1x4x512xbf16> to vector<4x512xbf16>
    %2 = arith.extf %1 : vector<4x512xbf16> to vector<4x512xf32>
    %c0_2 = arith.constant 0 : index
    %c0_3 = arith.constant 0 : index
    %3 = vector.load %arg2[%c0_2, %c0_3] : memref<4x1xf32, #tpu.memory_space<vmem>>, vector<4x1xf32>
    %4 = vector.broadcast %3 : vector<4x1xf32> to vector<4x512xf32>
    %5 = arith.mulf %2, %4 : vector<4x512xf32>
    %c0_4 = arith.constant 0 : index
    %c0_5 = arith.constant 0 : index
    %6 = vector.load %arg3[%c0_4, %c0_5] : memref<4x1xf32, #tpu.memory_space<vmem>>, vector<4x1xf32>
    %7 = vector.broadcast %6 : vector<4x1xf32> to vector<4x512xf32>
    %8 = arith.addf %5, %7 : vector<4x512xf32>
    %cst = arith.constant 0.000000e+00 : f32
    %9 = vector.broadcast %cst : f32 to vector<4x512xf32>
    %10 = arith.maximumf %8, %9 : vector<4x512xf32>
    %cst_6 = arith.constant 0.000000e+00 : bf16
    %11 = vector.broadcast %cst_6 : bf16 to vector<20x512xbf16>
    %c108 = arith.constant 108 : index
    %c0_7 = arith.constant 0 : index
    %12 = vector.load %arg8[%c108, %c0_7] : memref<128x512xbf16, #tpu.memory_space<vmem>>, vector<20x512xbf16>
    tpu.vector_store %arg8[%c108, %c0_7], %11 {strides = array<i32>} : memref<128x512xbf16, #tpu.memory_space<vmem>>, vector<20x512xbf16>,
    %c73_i32 = arith.constant 73 : i32
    %13 = tpu.dynamic_rotate %10 by %c73_i32 dim 1 : vector<4x512xf32>, i32 -> vector<4x512xf32>
    %c0_8 = arith.constant 0 : index
    %c0_9 = arith.constant 0 : index
    %14 = vector.load %arg4[%c0_8, %c0_9] : memref<27x512xf32, #tpu.memory_space<vmem>>, vector<1x512xf32>
    %15 = vector.broadcast %14 : vector<1x512xf32> to vector<4x512xf32>
    %16 = arith.mulf %13, %15 : vector<4x512xf32>
    %17 = arith.truncf %16 : vector<4x512xf32> to vector<4x512xbf16>
    %c0_10 = arith.constant 0 : index
    %c0_11 = arith.constant 0 : index
    %18 = vector.load %arg8[%c0_10, %c0_11] : memref<128x512xbf16, #tpu.memory_space<vmem>>, vector<4x512xbf16>
    tpu.vector_store %arg8[%c0_10, %c0_11], %17 {strides = array<i32>} : memref<128x512xbf16, #tpu.memory_space<vmem>>, vector<4x512xbf16>,
    %c72_i32 = arith.constant 72 : i32
    %19 = tpu.dynamic_rotate %10 by %c72_i32 dim 1 : vector<4x512xf32>, i32 -> vector<4x512xf32>
    %c1 = arith.constant 1 : index
    %c0_12 = arith.constant 0 : index
    %20 = vector.load %arg4[%c1, %c0_12] : memref<27x512xf32, #tpu.memory_space<vmem>>, vector<1x512xf32>
    %21 = vector.broadcast %20 : vector<1x512xf32> to vector<4x512xf32>
    %22 = arith.mulf %19, %21 : vector<4x512xf32>
    %23 = arith.truncf %22 : vector<4x512xf32> to vector<4x512xbf16>
    %c4 = arith.constant 4 : index
    %c0_13 = arith.constant 0 : index
    %24 = vector.load %arg8[%c4, %c0_13] : memref<128x512xbf16, #tpu.memory_space<vmem>>, vector<4x512xbf16>
    tpu.vector_store %arg8[%c4, %c0_13], %23 {strides = array<i32>} : memref<128x512xbf16, #tpu.memory_space<vmem>>, vector<4x512xbf16>,
    %c71_i32 = arith.constant 71 : i32
    %25 = tpu.dynamic_rotate %10 by %c71_i32 dim 1 : vector<4x512xf32>, i32 -> vector<4x512xf32>
    %c2 = arith.constant 2 : index
    %c0_14 = arith.constant 0 : index
    %26 = vector.load %arg4[%c2, %c0_14] : memref<27x512xf32, #tpu.memory_space<vmem>>, vector<1x512xf32>
    %27 = vector.broadcast %26 : vector<1x512xf32> to vector<4x512xf32>
    %28 = arith.mulf %25, %27 : vector<4x512xf32>
    %29 = arith.truncf %28 : vector<4x512xf32> to vector<4x512xbf16>
    %c8 = arith.constant 8 : index
    %c0_15 = arith.constant 0 : index
    %30 = vector.load %arg8[%c8, %c0_15] : memref<128x512xbf16, #tpu.memory_space<vmem>>, vector<4x512xbf16>
    tpu.vector_store %arg8[%c8, %c0_15], %29 {strides = array<i32>} : memref<128x512xbf16, #tpu.memory_space<vmem>>, vector<4x512xbf16>,
    %c65_i32 = arith.constant 65 : i32
    %31 = tpu.dynamic_rotate %10 by %c65_i32 dim 1 : vector<4x512xf32>, i32 -> vector<4x512xf32>
    %c3 = arith.constant 3 : index
    %c0_16 = arith.constant 0 : index
    %32 = vector.load %arg4[%c3, %c0_16] : memref<27x512xf32, #tpu.memory_space<vmem>>, vector<1x512xf32>
    %33 = vector.broadcast %32 : vector<1x512xf32> to vector<4x512xf32>
    %34 = arith.mulf %31, %33 : vector<4x512xf32>
    %35 = arith.truncf %34 : vector<4x512xf32> to vector<4x512xbf16>
    %c12 = arith.constant 12 : index
    %c0_17 = arith.constant 0 : index
    %36 = vector.load %arg8[%c12, %c0_17] : memref<128x512xbf16, #tpu.memory_space<vmem>>, vector<4x512xbf16>
    tpu.vector_store %arg8[%c12, %c0_17], %35 {strides = array<i32>} : memref<128x512xbf16, #tpu.memory_space<vmem>>, vector<4x512xbf16>,
    %c64_i32 = arith.constant 64 : i32
    %37 = tpu.dynamic_rotate %10 by %c64_i32 dim 1 : vector<4x512xf32>, i32 -> vector<4x512xf32>
    %c4_18 = arith.constant 4 : index
    %c0_19 = arith.constant 0 : index
    %38 = vector.load %arg4[%c4_18, %c0_19] : memref<27x512xf32, #tpu.memory_space<vmem>>, vector<1x512xf32>
    %39 = vector.broadcast %38 : vector<1x512xf32> to vector<4x512xf32>
    %40 = arith.mulf %37, %39 : vector<4x512xf32>
    %41 = arith.truncf %40 : vector<4x512xf32> to vector<4x512xbf16>
    %c16 = arith.constant 16 : index
    %c0_20 = arith.constant 0 : index
    %42 = vector.load %arg8[%c16, %c0_20] : memref<128x512xbf16, #tpu.memory_space<vmem>>, vector<4x512xbf16>
    tpu.vector_store %arg8[%c16, %c0_20], %41 {strides = array<i32>} : memref<128x512xbf16, #tpu.memory_space<vmem>>, vector<4x512xbf16>,
    %c63_i32 = arith.constant 63 : i32
    %43 = tpu.dynamic_rotate %10 by %c63_i32 dim 1 : vector<4x512xf32>, i32 -> vector<4x512xf32>
    %c5 = arith.constant 5 : index
    %c0_21 = arith.constant 0 : index
    %44 = vector.load %arg4[%c5, %c0_21] : memref<27x512xf32, #tpu.memory_space<vmem>>, vector<1x512xf32>
    %45 = vector.broadcast %44 : vector<1x512xf32> to vector<4x512xf32>
    %46 = arith.mulf %43, %45 : vector<4x512xf32>
    %47 = arith.truncf %46 : vector<4x512xf32> to vector<4x512xbf16>
    %c20 = arith.constant 20 : index
    %c0_22 = arith.constant 0 : index
    %48 = vector.load %arg8[%c20, %c0_22] : memref<128x512xbf16, #tpu.memory_space<vmem>>, vector<4x512xbf16>
    tpu.vector_store %arg8[%c20, %c0_22], %47 {strides = array<i32>} : memref<128x512xbf16, #tpu.memory_space<vmem>>, vector<4x512xbf16>,
    %c57_i32 = arith.constant 57 : i32
    %49 = tpu.dynamic_rotate %10 by %c57_i32 dim 1 : vector<4x512xf32>, i32 -> vector<4x512xf32>
    %c6 = arith.constant 6 : index
    %c0_23 = arith.constant 0 : index
    %50 = vector.load %arg4[%c6, %c0_23] : memref<27x512xf32, #tpu.memory_space<vmem>>, vector<1x512xf32>
    %51 = vector.broadcast %50 : vector<1x512xf32> to vector<4x512xf32>
    %52 = arith.mulf %49, %51 : vector<4x512xf32>
    %53 = arith.truncf %52 : vector<4x512xf32> to vector<4x512xbf16>
    %c24 = arith.constant 24 : index
    %c0_24 = arith.constant 0 : index
    %54 = vector.load %arg8[%c24, %c0_24] : memref<128x512xbf16, #tpu.memory_space<vmem>>, vector<4x512xbf16>
    tpu.vector_store %arg8[%c24, %c0_24], %53 {strides = array<i32>} : memref<128x512xbf16, #tpu.memory_space<vmem>>, vector<4x512xbf16>,
    %c56_i32 = arith.constant 56 : i32
    %55 = tpu.dynamic_rotate %10 by %c56_i32 dim 1 : vector<4x512xf32>, i32 -> vector<4x512xf32>
    %c7 = arith.constant 7 : index
    %c0_25 = arith.constant 0 : index
    %56 = vector.load %arg4[%c7, %c0_25] : memref<27x512xf32, #tpu.memory_space<vmem>>, vector<1x512xf32>
    %57 = vector.broadcast %56 : vector<1x512xf32> to vector<4x512xf32>
    %58 = arith.mulf %55, %57 : vector<4x512xf32>
    %59 = arith.truncf %58 : vector<4x512xf32> to vector<4x512xbf16>
    %c28 = arith.constant 28 : index
    %c0_26 = arith.constant 0 : index
    %60 = vector.load %arg8[%c28, %c0_26] : memref<128x512xbf16, #tpu.memory_space<vmem>>, vector<4x512xbf16>
    tpu.vector_store %arg8[%c28, %c0_26], %59 {strides = array<i32>} : memref<128x512xbf16, #tpu.memory_space<vmem>>, vector<4x512xbf16>,
    %c55_i32 = arith.constant 55 : i32
    %61 = tpu.dynamic_rotate %10 by %c55_i32 dim 1 : vector<4x512xf32>, i32 -> vector<4x512xf32>
    %c8_27 = arith.constant 8 : index
    %c0_28 = arith.constant 0 : index
    %62 = vector.load %arg4[%c8_27, %c0_28] : memref<27x512xf32, #tpu.memory_space<vmem>>, vector<1x512xf32>
    %63 = vector.broadcast %62 : vector<1x512xf32> to vector<4x512xf32>
    %64 = arith.mulf %61, %63 : vector<4x512xf32>
    %65 = arith.truncf %64 : vector<4x512xf32> to vector<4x512xbf16>
    %c32 = arith.constant 32 : index
    %c0_29 = arith.constant 0 : index
    %66 = vector.load %arg8[%c32, %c0_29] : memref<128x512xbf16, #tpu.memory_space<vmem>>, vector<4x512xbf16>
    tpu.vector_store %arg8[%c32, %c0_29], %65 {strides = array<i32>} : memref<128x512xbf16, #tpu.memory_space<vmem>>, vector<4x512xbf16>,
    %c9_i32 = arith.constant 9 : i32
    %67 = tpu.dynamic_rotate %10 by %c9_i32 dim 1 : vector<4x512xf32>, i32 -> vector<4x512xf32>
    %c9 = arith.constant 9 : index
    %c0_30 = arith.constant 0 : index
    %68 = vector.load %arg4[%c9, %c0_30] : memref<27x512xf32, #tpu.memory_space<vmem>>, vector<1x512xf32>
    %69 = vector.broadcast %68 : vector<1x512xf32> to vector<4x512xf32>
    %70 = arith.mulf %67, %69 : vector<4x512xf32>
    %71 = arith.truncf %70 : vector<4x512xf32> to vector<4x512xbf16>
    %c36 = arith.constant 36 : index
    %c0_31 = arith.constant 0 : index
    %72 = vector.load %arg8[%c36, %c0_31] : memref<128x512xbf16, #tpu.memory_space<vmem>>, vector<4x512xbf16>
    tpu.vector_store %arg8[%c36, %c0_31], %71 {strides = array<i32>} : memref<128x512xbf16, #tpu.memory_space<vmem>>, vector<4x512xbf16>,
    %c8_i32 = arith.constant 8 : i32
    %73 = tpu.dynamic_rotate %10 by %c8_i32 dim 1 : vector<4x512xf32>, i32 -> vector<4x512xf32>
    %c10 = arith.constant 10 : index
    %c0_32 = arith.constant 0 : index
    %74 = vector.load %arg4[%c10, %c0_32] : memref<27x512xf32, #tpu.memory_space<vmem>>, vector<1x512xf32>
    %75 = vector.broadcast %74 : vector<1x512xf32> to vector<4x512xf32>
    %76 = arith.mulf %73, %75 : vector<4x512xf32>
    %77 = arith.truncf %76 : vector<4x512xf32> to vector<4x512xbf16>
    %c40 = arith.constant 40 : index
    %c0_33 = arith.constant 0 : index
    %78 = vector.load %arg8[%c40, %c0_33] : memref<128x512xbf16, #tpu.memory_space<vmem>>, vector<4x512xbf16>
    tpu.vector_store %arg8[%c40, %c0_33], %77 {strides = array<i32>} : memref<128x512xbf16, #tpu.memory_space<vmem>>, vector<4x512xbf16>,
    %c7_i32 = arith.constant 7 : i32
    %79 = tpu.dynamic_rotate %10 by %c7_i32 dim 1 : vector<4x512xf32>, i32 -> vector<4x512xf32>
    %c11 = arith.constant 11 : index
    %c0_34 = arith.constant 0 : index
    %80 = vector.load %arg4[%c11, %c0_34] : memref<27x512xf32, #tpu.memory_space<vmem>>, vector<1x512xf32>
    %81 = vector.broadcast %80 : vector<1x512xf32> to vector<4x512xf32>
    %82 = arith.mulf %79, %81 : vector<4x512xf32>
    %83 = arith.truncf %82 : vector<4x512xf32> to vector<4x512xbf16>
    %c44 = arith.constant 44 : index
    %c0_35 = arith.constant 0 : index
    %84 = vector.load %arg8[%c44, %c0_35] : memref<128x512xbf16, #tpu.memory_space<vmem>>, vector<4x512xbf16>
    tpu.vector_store %arg8[%c44, %c0_35], %83 {strides = array<i32>} : memref<128x512xbf16, #tpu.memory_space<vmem>>, vector<4x512xbf16>,
    %c1_i32 = arith.constant 1 : i32
    %85 = tpu.dynamic_rotate %10 by %c1_i32 dim 1 : vector<4x512xf32>, i32 -> vector<4x512xf32>
    %c12_36 = arith.constant 12 : index
    %c0_37 = arith.constant 0 : index
    %86 = vector.load %arg4[%c12_36, %c0_37] : memref<27x512xf32, #tpu.memory_space<vmem>>, vector<1x512xf32>
    %87 = vector.broadcast %86 : vector<1x512xf32> to vector<4x512xf32>
    %88 = arith.mulf %85, %87 : vector<4x512xf32>
    %89 = arith.truncf %88 : vector<4x512xf32> to vector<4x512xbf16>
    %c48 = arith.constant 48 : index
    %c0_38 = arith.constant 0 : index
    %90 = vector.load %arg8[%c48, %c0_38] : memref<128x512xbf16, #tpu.memory_space<vmem>>, vector<4x512xbf16>
    tpu.vector_store %arg8[%c48, %c0_38], %89 {strides = array<i32>} : memref<128x512xbf16, #tpu.memory_space<vmem>>, vector<4x512xbf16>,
    %c13 = arith.constant 13 : index
    %c0_39 = arith.constant 0 : index
    %91 = vector.load %arg4[%c13, %c0_39] : memref<27x512xf32, #tpu.memory_space<vmem>>, vector<1x512xf32>
    %92 = vector.broadcast %91 : vector<1x512xf32> to vector<4x512xf32>
    %93 = arith.mulf %10, %92 : vector<4x512xf32>
    %94 = arith.truncf %93 : vector<4x512xf32> to vector<4x512xbf16>
    %c52 = arith.constant 52 : index
    %c0_40 = arith.constant 0 : index
    %95 = vector.load %arg8[%c52, %c0_40] : memref<128x512xbf16, #tpu.memory_space<vmem>>, vector<4x512xbf16>
    tpu.vector_store %arg8[%c52, %c0_40], %94 {strides = array<i32>} : memref<128x512xbf16, #tpu.memory_space<vmem>>, vector<4x512xbf16>,
    %c511_i32 = arith.constant 511 : i32
    %96 = tpu.dynamic_rotate %10 by %c511_i32 dim 1 : vector<4x512xf32>, i32 -> vector<4x512xf32>
    %c14 = arith.constant 14 : index
    %c0_41 = arith.constant 0 : index
    %97 = vector.load %arg4[%c14, %c0_41] : memref<27x512xf32, #tpu.memory_space<vmem>>, vector<1x512xf32>
    %98 = vector.broadcast %97 : vector<1x512xf32> to vector<4x512xf32>
    %99 = arith.mulf %96, %98 : vector<4x512xf32>
    %100 = arith.truncf %99 : vector<4x512xf32> to vector<4x512xbf16>
    %c56 = arith.constant 56 : index
    %c0_42 = arith.constant 0 : index
    %101 = vector.load %arg8[%c56, %c0_42] : memref<128x512xbf16, #tpu.memory_space<vmem>>, vector<4x512xbf16>
    tpu.vector_store %arg8[%c56, %c0_42], %100 {strides = array<i32>} : memref<128x512xbf16, #tpu.memory_space<vmem>>, vector<4x512xbf16>,
    %c505_i32 = arith.constant 505 : i32
    %102 = tpu.dynamic_rotate %10 by %c505_i32 dim 1 : vector<4x512xf32>, i32 -> vector<4x512xf32>
    %c15 = arith.constant 15 : index
    %c0_43 = arith.constant 0 : index
    %103 = vector.load %arg4[%c15, %c0_43] : memref<27x512xf32, #tpu.memory_space<vmem>>, vector<1x512xf32>
    %104 = vector.broadcast %103 : vector<1x512xf32> to vector<4x512xf32>
    %105 = arith.mulf %102, %104 : vector<4x512xf32>
    %106 = arith.truncf %105 : vector<4x512xf32> to vector<4x512xbf16>
    %c60 = arith.constant 60 : index
    %c0_44 = arith.constant 0 : index
    %107 = vector.load %arg8[%c60, %c0_44] : memref<128x512xbf16, #tpu.memory_space<vmem>>, vector<4x512xbf16>
    tpu.vector_store %arg8[%c60, %c0_44], %106 {strides = array<i32>} : memref<128x512xbf16, #tpu.memory_space<vmem>>, vector<4x512xbf16>,
    %c504_i32 = arith.constant 504 : i32
    %108 = tpu.dynamic_rotate %10 by %c504_i32 dim 1 : vector<4x512xf32>, i32 -> vector<4x512xf32>
    %c16_45 = arith.constant 16 : index
    %c0_46 = arith.constant 0 : index
    %109 = vector.load %arg4[%c16_45, %c0_46] : memref<27x512xf32, #tpu.memory_space<vmem>>, vector<1x512xf32>
    %110 = vector.broadcast %109 : vector<1x512xf32> to vector<4x512xf32>
    %111 = arith.mulf %108, %110 : vector<4x512xf32>
    %112 = arith.truncf %111 : vector<4x512xf32> to vector<4x512xbf16>
    %c64 = arith.constant 64 : index
    %c0_47 = arith.constant 0 : index
    %113 = vector.load %arg8[%c64, %c0_47] : memref<128x512xbf16, #tpu.memory_space<vmem>>, vector<4x512xbf16>
    tpu.vector_store %arg8[%c64, %c0_47], %112 {strides = array<i32>} : memref<128x512xbf16, #tpu.memory_space<vmem>>, vector<4x512xbf16>,
    %c503_i32 = arith.constant 503 : i32
    %114 = tpu.dynamic_rotate %10 by %c503_i32 dim 1 : vector<4x512xf32>, i32 -> vector<4x512xf32>
    %c17 = arith.constant 17 : index
    %c0_48 = arith.constant 0 : index
    %115 = vector.load %arg4[%c17, %c0_48] : memref<27x512xf32, #tpu.memory_space<vmem>>, vector<1x512xf32>
    %116 = vector.broadcast %115 : vector<1x512xf32> to vector<4x512xf32>
    %117 = arith.mulf %114, %116 : vector<4x512xf32>
    %118 = arith.truncf %117 : vector<4x512xf32> to vector<4x512xbf16>
    %c68 = arith.constant 68 : index
    %c0_49 = arith.constant 0 : index
    %119 = vector.load %arg8[%c68, %c0_49] : memref<128x512xbf16, #tpu.memory_space<vmem>>, vector<4x512xbf16>
    tpu.vector_store %arg8[%c68, %c0_49], %118 {strides = array<i32>} : memref<128x512xbf16, #tpu.memory_space<vmem>>, vector<4x512xbf16>,
    %c457_i32 = arith.constant 457 : i32
    %120 = tpu.dynamic_rotate %10 by %c457_i32 dim 1 : vector<4x512xf32>, i32 -> vector<4x512xf32>
    %c18 = arith.constant 18 : index
    %c0_50 = arith.constant 0 : index
    %121 = vector.load %arg4[%c18, %c0_50] : memref<27x512xf32, #tpu.memory_space<vmem>>, vector<1x512xf32>
    %122 = vector.broadcast %121 : vector<1x512xf32> to vector<4x512xf32>
    %123 = arith.mulf %120, %122 : vector<4x512xf32>
    %124 = arith.truncf %123 : vector<4x512xf32> to vector<4x512xbf16>
    %c72 = arith.constant 72 : index
    %c0_51 = arith.constant 0 : index
    %125 = vector.load %arg8[%c72, %c0_51] : memref<128x512xbf16, #tpu.memory_space<vmem>>, vector<4x512xbf16>
    tpu.vector_store %arg8[%c72, %c0_51], %124 {strides = array<i32>} : memref<128x512xbf16, #tpu.memory_space<vmem>>, vector<4x512xbf16>,
    %c456_i32 = arith.constant 456 : i32
    %126 = tpu.dynamic_rotate %10 by %c456_i32 dim 1 : vector<4x512xf32>, i32 -> vector<4x512xf32>
    %c19 = arith.constant 19 : index
    %c0_52 = arith.constant 0 : index
    %127 = vector.load %arg4[%c19, %c0_52] : memref<27x512xf32, #tpu.memory_space<vmem>>, vector<1x512xf32>
    %128 = vector.broadcast %127 : vector<1x512xf32> to vector<4x512xf32>
    %129 = arith.mulf %126, %128 : vector<4x512xf32>
    %130 = arith.truncf %129 : vector<4x512xf32> to vector<4x512xbf16>
    %c76 = arith.constant 76 : index
    %c0_53 = arith.constant 0 : index
    %131 = vector.load %arg8[%c76, %c0_53] : memref<128x512xbf16, #tpu.memory_space<vmem>>, vector<4x512xbf16>
    tpu.vector_store %arg8[%c76, %c0_53], %130 {strides = array<i32>} : memref<128x512xbf16, #tpu.memory_space<vmem>>, vector<4x512xbf16>,
    %c455_i32 = arith.constant 455 : i32
    %132 = tpu.dynamic_rotate %10 by %c455_i32 dim 1 : vector<4x512xf32>, i32 -> vector<4x512xf32>
    %c20_54 = arith.constant 20 : index
    %c0_55 = arith.constant 0 : index
    %133 = vector.load %arg4[%c20_54, %c0_55] : memref<27x512xf32, #tpu.memory_space<vmem>>, vector<1x512xf32>
    %134 = vector.broadcast %133 : vector<1x512xf32> to vector<4x512xf32>
    %135 = arith.mulf %132, %134 : vector<4x512xf32>
    %136 = arith.truncf %135 : vector<4x512xf32> to vector<4x512xbf16>
    %c80 = arith.constant 80 : index
    %c0_56 = arith.constant 0 : index
    %137 = vector.load %arg8[%c80, %c0_56] : memref<128x512xbf16, #tpu.memory_space<vmem>>, vector<4x512xbf16>
    tpu.vector_store %arg8[%c80, %c0_56], %136 {strides = array<i32>} : memref<128x512xbf16, #tpu.memory_space<vmem>>, vector<4x512xbf16>,
    %c449_i32 = arith.constant 449 : i32
    %138 = tpu.dynamic_rotate %10 by %c449_i32 dim 1 : vector<4x512xf32>, i32 -> vector<4x512xf32>
    %c21 = arith.constant 21 : index
    %c0_57 = arith.constant 0 : index
    %139 = vector.load %arg4[%c21, %c0_57] : memref<27x512xf32, #tpu.memory_space<vmem>>, vector<1x512xf32>
    %140 = vector.broadcast %139 : vector<1x512xf32> to vector<4x512xf32>
    %141 = arith.mulf %138, %140 : vector<4x512xf32>
    %142 = arith.truncf %141 : vector<4x512xf32> to vector<4x512xbf16>
    %c84 = arith.constant 84 : index
    %c0_58 = arith.constant 0 : index
    %143 = vector.load %arg8[%c84, %c0_58] : memref<128x512xbf16, #tpu.memory_space<vmem>>, vector<4x512xbf16>
    tpu.vector_store %arg8[%c84, %c0_58], %142 {strides = array<i32>} : memref<128x512xbf16, #tpu.memory_space<vmem>>, vector<4x512xbf16>,
    %c448_i32 = arith.constant 448 : i32
    %144 = tpu.dynamic_rotate %10 by %c448_i32 dim 1 : vector<4x512xf32>, i32 -> vector<4x512xf32>
    %c22 = arith.constant 22 : index
    %c0_59 = arith.constant 0 : index
    %145 = vector.load %arg4[%c22, %c0_59] : memref<27x512xf32, #tpu.memory_space<vmem>>, vector<1x512xf32>
    %146 = vector.broadcast %145 : vector<1x512xf32> to vector<4x512xf32>
    %147 = arith.mulf %144, %146 : vector<4x512xf32>
    %148 = arith.truncf %147 : vector<4x512xf32> to vector<4x512xbf16>
    %c88 = arith.constant 88 : index
    %c0_60 = arith.constant 0 : index
    %149 = vector.load %arg8[%c88, %c0_60] : memref<128x512xbf16, #tpu.memory_space<vmem>>, vector<4x512xbf16>
    tpu.vector_store %arg8[%c88, %c0_60], %148 {strides = array<i32>} : memref<128x512xbf16, #tpu.memory_space<vmem>>, vector<4x512xbf16>,
    %c447_i32 = arith.constant 447 : i32
    %150 = tpu.dynamic_rotate %10 by %c447_i32 dim 1 : vector<4x512xf32>, i32 -> vector<4x512xf32>
    %c23 = arith.constant 23 : index
    %c0_61 = arith.constant 0 : index
    %151 = vector.load %arg4[%c23, %c0_61] : memref<27x512xf32, #tpu.memory_space<vmem>>, vector<1x512xf32>
    %152 = vector.broadcast %151 : vector<1x512xf32> to vector<4x512xf32>
    %153 = arith.mulf %150, %152 : vector<4x512xf32>
    %154 = arith.truncf %153 : vector<4x512xf32> to vector<4x512xbf16>
    %c92 = arith.constant 92 : index
    %c0_62 = arith.constant 0 : index
    %155 = vector.load %arg8[%c92, %c0_62] : memref<128x512xbf16, #tpu.memory_space<vmem>>, vector<4x512xbf16>
    tpu.vector_store %arg8[%c92, %c0_62], %154 {strides = array<i32>} : memref<128x512xbf16, #tpu.memory_space<vmem>>, vector<4x512xbf16>,
    %c441_i32 = arith.constant 441 : i32
    %156 = tpu.dynamic_rotate %10 by %c441_i32 dim 1 : vector<4x512xf32>, i32 -> vector<4x512xf32>
    %c24_63 = arith.constant 24 : index
    %c0_64 = arith.constant 0 : index
    %157 = vector.load %arg4[%c24_63, %c0_64] : memref<27x512xf32, #tpu.memory_space<vmem>>, vector<1x512xf32>
    %158 = vector.broadcast %157 : vector<1x512xf32> to vector<4x512xf32>
    %159 = arith.mulf %156, %158 : vector<4x512xf32>
    %160 = arith.truncf %159 : vector<4x512xf32> to vector<4x512xbf16>
    %c96 = arith.constant 96 : index
    %c0_65 = arith.constant 0 : index
    %161 = vector.load %arg8[%c96, %c0_65] : memref<128x512xbf16, #tpu.memory_space<vmem>>, vector<4x512xbf16>
    tpu.vector_store %arg8[%c96, %c0_65], %160 {strides = array<i32>} : memref<128x512xbf16, #tpu.memory_space<vmem>>, vector<4x512xbf16>,
    %c440_i32 = arith.constant 440 : i32
    %162 = tpu.dynamic_rotate %10 by %c440_i32 dim 1 : vector<4x512xf32>, i32 -> vector<4x512xf32>
    %c25 = arith.constant 25 : index
    %c0_66 = arith.constant 0 : index
    %163 = vector.load %arg4[%c25, %c0_66] : memref<27x512xf32, #tpu.memory_space<vmem>>, vector<1x512xf32>
    %164 = vector.broadcast %163 : vector<1x512xf32> to vector<4x512xf32>
    %165 = arith.mulf %162, %164 : vector<4x512xf32>
    %166 = arith.truncf %165 : vector<4x512xf32> to vector<4x512xbf16>
    %c100 = arith.constant 100 : index
    %c0_67 = arith.constant 0 : index
    %167 = vector.load %arg8[%c100, %c0_67] : memref<128x512xbf16, #tpu.memory_space<vmem>>, vector<4x512xbf16>
    tpu.vector_store %arg8[%c100, %c0_67], %166 {strides = array<i32>} : memref<128x512xbf16, #tpu.memory_space<vmem>>, vector<4x512xbf16>,
    %c439_i32 = arith.constant 439 : i32
    %168 = tpu.dynamic_rotate %10 by %c439_i32 dim 1 : vector<4x512xf32>, i32 -> vector<4x512xf32>
    %c26 = arith.constant 26 : index
    %c0_68 = arith.constant 0 : index
    %169 = vector.load %arg4[%c26, %c0_68] : memref<27x512xf32, #tpu.memory_space<vmem>>, vector<1x512xf32>
    %170 = vector.broadcast %169 : vector<1x512xf32> to vector<4x512xf32>
    %171 = arith.mulf %168, %170 : vector<4x512xf32>
    %172 = arith.truncf %171 : vector<4x512xf32> to vector<4x512xbf16>
    %c104 = arith.constant 104 : index
    %c0_69 = arith.constant 0 : index
    %173 = vector.load %arg8[%c104, %c0_69] : memref<128x512xbf16, #tpu.memory_space<vmem>>, vector<4x512xbf16>
    tpu.vector_store %arg8[%c104, %c0_69], %172 {strides = array<i32>} : memref<128x512xbf16, #tpu.memory_space<vmem>>, vector<4x512xbf16>,
    %c0_70 = arith.constant 0 : index
    %c0_71 = arith.constant 0 : index
    %174 = vector.load %arg5[%c0_70, %c0_71] : memref<8x128xbf16, #tpu.memory_space<vmem>>, vector<8x128xbf16>
    %c0_72 = arith.constant 0 : index
    %c0_73 = arith.constant 0 : index
    %175 = vector.load %arg8[%c0_72, %c0_73] : memref<128x512xbf16, #tpu.memory_space<vmem>>, vector<128x512xbf16>
    %cst_74 = arith.constant dense<0.000000e+00> : vector<8x512xf32>
    %176 = tpu.matmul %174, %175, %cst_74 {dimension_numbers = #tpu.dot_dimension_numbers<[1], [0], [0], [1], [0, 0, 1, 1], [], []>} : vector<8x128xbf16>, vector<128x512xbf16>, vector<8x512xf32> -> vector<8x512xf32>
    %c0_75 = arith.constant 0 : index
    %c0_76 = arith.constant 0 : index
    %177 = vector.load %arg6[%c0_75, %c0_76] : memref<8x1xf32, #tpu.memory_space<vmem>>, vector<8x1xf32>
    %178 = vector.broadcast %177 : vector<8x1xf32> to vector<8x512xf32>
    %179 = arith.addf %176, %178 : vector<8x512xf32>
    %c0_77 = arith.constant 0 : index
    %c0_78 = arith.constant 0 : index
    %c0_79 = arith.constant 0 : index
    %180 = vector.load %arg7[%c0_77, %c0_78, %c0_79] : memref<1x8x512xf32, #tpu.memory_space<vmem>>, vector<1x8x512xf32>
    %181 = vector.shape_cast %180 : vector<1x8x512xf32> to vector<8x512xf32>
    %182 = vector.shape_cast %179 : vector<8x512xf32> to vector<1x8x512xf32>
    tpu.vector_store %arg7[%c0_77, %c0_78, %c0_79], %182 {strides = array<i32>} : memref<1x8x512xf32, #tpu.memory_space<vmem>>, vector<1x8x512xf32>,
    return
  }
  func.func @transform_0(%arg0: i32) -> (i32, i32, i32) {
    %c0_i32 = arith.constant 0 : i32
    %c0_i32_0 = arith.constant 0 : i32
    %c0_i32_1 = arith.constant 0 : i32
    return %arg0, %c0_i32, %c0_i32_0 : i32, i32, i32
  }
  func.func @transform_1(%arg0: i32) -> (i32, i32) {
    %c0_i32 = arith.constant 0 : i32
    %c0_i32_0 = arith.constant 0 : i32
    %c0_i32_1 = arith.constant 0 : i32
    return %c0_i32, %c0_i32_0 : i32, i32
  }
  func.func @transform_2(%arg0: i32) -> (i32, i32) {
    %c0_i32 = arith.constant 0 : i32
    %c0_i32_0 = arith.constant 0 : i32
    %c0_i32_1 = arith.constant 0 : i32
    return %c0_i32, %c0_i32_0 : i32, i32
  }
  func.func @transform_3(%arg0: i32) -> (i32, i32) {
    %c0_i32 = arith.constant 0 : i32
    %c0_i32_0 = arith.constant 0 : i32
    %c0_i32_1 = arith.constant 0 : i32
    return %c0_i32, %c0_i32_0 : i32, i32
  }
  func.func @transform_4(%arg0: i32) -> (i32, i32) {
    %c0_i32 = arith.constant 0 : i32
    %c0_i32_0 = arith.constant 0 : i32
    %c0_i32_1 = arith.constant 0 : i32
    return %c0_i32, %c0_i32_0 : i32, i32
  }
  func.func @transform_5(%arg0: i32) -> (i32, i32) {
    %c0_i32 = arith.constant 0 : i32
    %c0_i32_0 = arith.constant 0 : i32
    %c0_i32_1 = arith.constant 0 : i32
    return %c0_i32, %c0_i32_0 : i32, i32
  }
  func.func @transform_6(%arg0: i32) -> (i32, i32, i32) {
    %c0_i32 = arith.constant 0 : i32
    %c0_i32_0 = arith.constant 0 : i32
    %c0_i32_1 = arith.constant 0 : i32
    return %arg0, %c0_i32, %c0_i32_0 : i32, i32, i32
  }
}

</mosaic_0001>

<bundles_post_ra>
// kernel: conv3d_forward.1
= control target key start
LH: loop header
LB: loop body
LE: loop exit
PB: predicated region body
PF: predicated region fallthrough
CT: control target
= control target key end

     0   :  { %s2023_s21 = smov 0   ;;  %s2786_s0 = inlined_call_operand.vmem [shape: bf16[2,4,512], index: 0, kind: input, shape index: {}]   ;;  %s2787_s1 = inlined_call_operand.vmem [shape: f32[4,1], index: 1, kind: input, shape index: {}]   ;;  %s2788_s2 = inlined_call_operand.vmem [shape: f32[4,1], index: 2, kind: input, shape index: {}]   ;;  %s2789_s3 = inlined_call_operand.vmem [shape: f32[27,512], index: 3, kind: input, shape index: {}]   ;;  %s2790_s4 = inlined_call_operand.vmem [shape: bf16[8,128], index: 4, kind: input, shape index: {}]   ;;  %s2791_s5 = inlined_call_operand.vmem [shape: f32[8,1], index: 5, kind: input, shape index: {}]   ;;  %s2792_s6 = inlined_call_operand.vmem [shape: f32[2,8,512], index: 6, kind: output, shape index: {}]  }
   0x1 LB: > { %s1893_s22 = sadd.s32 4294967295, %s1967_s21   ;;  %p1897_p0 = scmp.ge.s32.totalorder %s1967_s21, 1  ;;  %s1967_s21 = sphi %s2023_s21, %s16_s21  }
   0x2   : > { %p212_p1 = scmp.lt.s32.totalorder %s1967_s21, 3 }
   0x4   : > { %p213_p2 = pnand %p1897_p0, %p212_p1 }
   0x5   : > { %v256_v0 = vld [vmem:[%s2787_s1] sm:$0xf] (!%p213_p2)  ;;  %v1969_v1 = vmov (!%p213_p2), 0   ;;  %p242_p3 = scmp.lt.s32.totalorder (!%p213_p2), %s1893_s22, 1  ;;  %v1970_v3 = vmov (!%p213_p2), 839922192   ;;  %v264_v5 = vlaneseq (!%p213_p2) }
   0x6   : > { %216 = sbr.rel (%p213_p2) target bundleno = 642 (0x282), region = 44  ;;  %1959 = vset.pattern.permute.xlu0 (!%p213_p2), %v1969_v1  ;;  %288 = vst [vmem:[#allocation2 + $0xc0] sm:$0xc0] (!%p213_p2), %v1969_v1  ;;  %289 = vst [vmem:[#allocation2 + $0xc8] sm:$0xc0] (!%p213_p2), %v1969_v1  ;;  %1784 = vmatprep.mubr.bf16.mxu0 (!%p213_p2), %v1969_v1  ;;  %v262_v4 = vunpack.c.l.s4 (!%p213_p2), %v1970_v3  ;;  %s1971_s9 = smov (!%p213_p2), 72  }
   0x7   : > { %290 = vst [vmem:[#allocation2 + $0xd0] sm:$0xc0] (!%p213_p2), %v1969_v1  ;;  %291 = vst [vmem:[#allocation2 + $0xd8] sm:$0xc0] (!%p213_p2), %v1969_v1  ;;  %259 = vperm.xlu0 (!%p213_p2), %1959, %v256_v0   ;;  %1825 = vmatprep.mubr.bf16.mxu1 (!%p213_p2), %v1969_v1  ;;  %v271_v2 = vld [vmem:[%s2788_s2] sm:$0xf] (!%p213_p2) }
   0x8   : > { %292 = vst [vmem:[#allocation2 + $0xe0] sm:$0xff] (!%p213_p2), %v1969_v1  ;;  %v263_v6 = vunpack.c.0.s8 (!%p213_p2), %v262_v4  ;;  %v265_v7 = vshrl.u32 (!%p213_p2), %v264_v5, 7  ;;  %v1914_v18 = vld [vmem:[%s2789_s3 + $0x25] ss:$8 sm:$0xf] (!%p213_p2)  ;;  %s1972_s10 = smov (!%p213_p2), 71  }
   0x9   : > { %s1973_s11 = smov (!%p213_p2), 65   ;;  %s1974_s12 = smov (!%p213_p2), 73   ;;  %v2133_v47 = vld [vmem:[%s2789_s3 + $0x1] ss:$8 sm:$0xf] (!%p213_p2)  ;;  %v2141_v49 = vand.u32 (!%p213_p2), 127, %v264_v5 }
   0xa   : > { %v266_v8 = vsub.s32 (!%p213_p2), %v263_v6, %v265_v7  ;;  %v2044_v10 = vsub.s32 (!%p213_p2), 0, %v265_v7  ;;  %v2046_v11 = vsub.s32 (!%p213_p2), 1, %v265_v7  ;;  %v2048_v12 = vsub.s32 (!%p213_p2), 2, %v265_v7  ;;  %s1975_s13 = smov (!%p213_p2), 63   ;;  %s1976_s14 = smov (!%p213_p2), 57  }
   0xb   : > { %274 = vperm.xlu0 (!%p213_p2), %1959, %v271_v2   ;;  %v2050_v13 = vsub.s32 (!%p213_p2), 3, %v265_v7  ;;  %s1977_s15 = smov (!%p213_p2), 56   ;;  %s1978_s16 = smov (!%p213_p2), 64   ;;  %v2138_v48 = vld [vmem:[%s2789_s3 + $0x43] ss:$8 sm:$0xf] (!%p213_p2) }
   0xc   : > { %v1041_v20 = vrot.slane (!%p213_p2), %v1914_v18, %v2044_v10  ;;  %v1045_v21 = vrot.slane (!%p213_p2), %v1914_v18, %v2046_v11  ;;  %v1049_v22 = vrot.slane (!%p213_p2), %v1914_v18, %v2048_v12  ;;  %s1979_s17 = smov (!%p213_p2), 9   ;;  %s1980_s18 = smov (!%p213_p2), 8   ;;  %v2149_v50 = vld [vmem:[%s2789_s3 + $0x2] ss:$8 sm:$0xf] (!%p213_p2)  ;;  %v374_v51 = vrot.slane (!%p213_p2), %v2133_v47, %v2046_v11 }
   0xd   : > { %s2794_s22 = smov (!%p242_p3, %s1893_s22), 1  ;;  %v1053_v23 = vrot.slane %v1914_v18, %v2050_v13  ;;  %s1981_s19 = smov 7   ;;  %v2156_v52 = vld [vmem:[%s2789_s3 + $0x44] ss:$8 sm:$0xf]  ;;  %v378_v55 = vrot.slane %v2133_v47, %v2048_v12  ;;  %v1367_v56 = vrot.slane %v2138_v48, %v2044_v10  ;;  %v1371_v57 = vrot.slane %v2138_v48, %v2046_v11 }
   0xe   : > { %s1930_s27 = sshll.u32 %s2794_s22, 3  ;;  %v1054_v29 = vcombine.low %v1041_v20, %v1045_v21  ;;  %s1982_s20 = smov 55   ;;  %v370_v58 = vrot.slane %v2133_v47, %v2044_v10  ;;  %v382_v59 = vrot.slane %v2133_v47, %v2050_v13  ;;  %v1375_v60 = vrot.slane %v2138_v48, %v2048_v12  ;;  %v2177_v63 = vld [vmem:[%s2789_s3 + $0x3] ss:$8 sm:$0xf] }
   0xf   : > { %s246_s30 = scalar_lea.vmem %s2786_s0, %s1930_s27  ;;  %v1055_v30 = vcombine.low %v1049_v22, %v1053_v23  ;;  %s1983_s23 = smov 127   ;;  %v1379_v61 = vrot.slane %v2138_v48, %v2050_v13  ;;  %v434_v62 = vrot.slane %v2149_v50, %v2046_v11  ;;  %v2182_v0 = vld [vmem:[%s2789_s3 + $0x45] ss:$8 sm:$0xf]  ;;  %vm359_vm0 = vcmp.lt.s32.totalorder %v2141_v49, 72 }
  0x10   : > { %v253_v9 = vld [vmem:[%s246_s30] sm:$0xff]  ;;  %s1984_s24 = smov 121   ;;  %s1985_s25 = smov 1   ;;  %v438_v1 = vrot.slane %v2149_v50, %v2048_v12  ;;  %v1414_v2 = vrot.slane %v2156_v52, %v2044_v10  ;;  %v1418_v3 = vrot.slane %v2156_v52, %v2046_v11  ;;  %vm419_vm1 = vcmp.lt.s32.totalorder %v2141_v49, 71 }
  0x11   : > { %v254_v15 = vunpack.c.l.bf16 %v253_v9  ;;  %v255_v16 = vunpack.c.h.bf16 %v253_v9  ;;  %v430_v4 = vrot.slane %v2149_v50, %v2044_v10  ;;  %v442_v5 = vrot.slane %v2149_v50, %v2050_v13  ;;  %v2217_v18 = vld [vmem:[%s2789_s3] ss:$8 sm:$0xf] }
  0x12   : > { %v1422_v6 = vrot.slane %v2156_v52, %v2048_v12  ;;  %v1426_v7 = vrot.slane %v2156_v52, %v2050_v13  ;;  %v490_v21 = vrot.slane %v2177_v63, %v2044_v10  ;;  %v502_v22 = vrot.slane %v2177_v63, %v2050_v13 }
  0x13   : > { %vm479_vm2 = vcmp.lt.s32.totalorder %v2141_v49, 65  ;;  %vm312_vm3 = vcmp.lt.s32.totalorder %v2141_v49, 73  ;;  %vm587_vm4 = vcmp.lt.s32.totalorder %v2141_v49, 63  ;;  %vm647_vm5 = vcmp.lt.s32.totalorder %v2141_v49, 57 }
  0x14   : > { %vm707_vm6 = vcmp.lt.s32.totalorder %v2141_v49, 56  ;;  %vm539_vm7 = vcmp.lt.s32.totalorder %v2141_v49, 64  ;;  %vm815_vm8 = vcmp.lt.s32.totalorder %v2141_v49, 9  ;;  %vm875_vm9 = vcmp.lt.s32.totalorder %v2141_v49, 8 }
  0x15   : > { %vm935_vm10 = vcmp.lt.s32.totalorder %v2141_v49, 7  ;;  %vm767_vm11 = vcmp.lt.s32.totalorder %v2141_v49, 55  ;;  %vm1094_vm12 = vcmp.lt.s32.totalorder %v2141_v49, 127  ;;  %vm1154_vm13 = vcmp.lt.s32.totalorder %v2141_v49, 121 }
  0x16   : > { %vm995_vm14 = vcmp.lt.s32.totalorder %v2141_v49, 1  ;;  %vm1262_vm15 = vcmp.lt.s32.totalorder %v2141_v49, 119 }
  0x86   : > { %v260_v14 = vpop.permute.xlu0 %259 }
  0x87   : > { %v267_v17 = vrot.slane %v260_v14, %v266_v8  ;;  %v494_v14 = vrot.slane %v2177_v63, %v2046_v11 }
  0x89   : > { %v269_v24 = vmul.f32 %v267_v17, %v254_v15  ;;  %v270_v25 = vmul.f32 %v267_v17, %v255_v16  ;;  %v498_v15 = vrot.slane %v2177_v63, %v2048_v12  ;;  %v1449_v16 = vrot.slane %v2182_v0, %v2044_v10 }
  0x8a   : > { %v275_v19 = vpop.permute.xlu0 %274  ;;  %v1453_v17 = vrot.slane %v2182_v0, %v2046_v11 }
  0x8b   : > { %v282_v26 = vrot.slane %v275_v19, %v266_v8 }
  0x8d   : > { %v284_v27 = vadd.f32 %v282_v26, %v269_v24  ;;  %v285_v28 = vadd.f32 %v282_v26, %v270_v25 }
  0x8f   : > { %v2059_v31 = vmax.f32 %v284_v27, 0.0  ;;  %v2061_v32 = vmax.f32 %v285_v28, 0.0  ;;  %v2232_v27 = vld [vmem:[%s2789_s3 + $0x42] ss:$8 sm:$0xf]  ;;  %v1457_v28 = vrot.slane %v2182_v0, %v2048_v12 }
  0x91   : > { %355 = vrot.lane.b32.xlu0 %v2061_v32, %s1971_s9  ;;  %351 = vrot.lane.b32.xlu1 %v2059_v31, %s1971_s9  ;;  %v1058_v33 = vmul.f32 %v1054_v29, %v2059_v31  ;;  %v1059_v34 = vmul.f32 %v1055_v30, %v2061_v32  ;;  %v2069_v35 = vcombine.high %v2059_v31, %v2059_v31 }
  0x92   : > { %v2075_v43 = vcombine.high %v2061_v32, %v2061_v32  ;;  %v1461_v29 = vrot.slane %v2182_v0, %v2050_v13  ;;  %v326_v30 = vrot.slane %v2217_v18, %v2046_v11  ;;  %v2395_v0 = vld [vmem:[%s2789_s3 + $0x60] ss:$8 sm:$0xf] }
  0x93   : > { %v1062_v36 = vcombine.high %v1058_v33, %v1058_v33  ;;  %v1066_v37 = vpack.c.bf16 %v1058_v33, %v1058_v33  ;;  %v1063_v38 = vcombine.high %v1059_v34, %v1059_v34  ;;  %v1068_v39 = vpack.c.bf16 %v1059_v34, %v1059_v34 }
  0x94   : > { %v330_v33 = vrot.slane %v2217_v18, %v2048_v12 }
  0x95   : > { %411 = vrot.lane.b32.xlu0 %v2059_v31, %s1972_s10  ;;  %353 = vrot.lane.b32.xlu1 %v2069_v35, %s1971_s9  ;;  %v1067_v40 = vpack.c.bf16 %v1062_v36, %v1062_v36  ;;  %v1074_v41 = vrot.slane %v1066_v37, 6  ;;  %v1069_v42 = vpack.c.bf16 %v1063_v38, %v1063_v38  ;;  %v1076_v44 = vrot.slane %v1068_v39, 6 }
  0x97   : > { %1082 = vst [vmem:[#allocation2 + $0x60] sm:$0xc] %v1074_v41  ;;  %1084 = vst [vmem:[#allocation2 + $0x70] sm:$0xc] %v1076_v44  ;;  %v1075_v45 = vrot.slane %v1067_v40, 6  ;;  %v1077_v46 = vrot.slane %v1069_v42, 6  ;;  %v1320_v44 = vrot.slane %v2232_v27, %v2044_v10 }
  0x99   : > { %415 = vrot.lane.b32.xlu0 %v2061_v32, %s1972_s10  ;;  %357 = vrot.lane.b32.xlu1 %v2075_v43, %s1971_s9  ;;  %1083 = vst [vmem:[#allocation2 + $0x68] sm:$0xc] %v1075_v45  ;;  %1085 = vst [vmem:[#allocation2 + $0x78] sm:$0xc] %v1077_v46  ;;  %v1324_v45 = vrot.slane %v2232_v27, %v2046_v11 }
  0x9d   : > { %471 = vrot.lane.b32.xlu0 %v2059_v31, %s1973_s11  ;;  %413 = vrot.lane.b32.xlu1 %v2069_v35, %s1972_s10 }
  0xa1   : > { %475 = vrot.lane.b32.xlu0 %v2061_v32, %s1973_s11  ;;  %417 = vrot.lane.b32.xlu1 %v2075_v43, %s1972_s10 }
  0xa5   : > { %302 = vrot.lane.b32.xlu0 %v2059_v31, %s1974_s12  ;;  %473 = vrot.lane.b32.xlu1 %v2069_v35, %s1973_s11 }
  0xa9   : > { %306 = vrot.lane.b32.xlu0 %v2061_v32, %s1974_s12  ;;  %477 = vrot.lane.b32.xlu1 %v2075_v43, %s1973_s11 }
  0xad   : > { %579 = vrot.lane.b32.xlu0 %v2059_v31, %s1975_s13  ;;  %304 = vrot.lane.b32.xlu1 %v2069_v35, %s1974_s12 }
  0xb1   : > { %583 = vrot.lane.b32.xlu0 %v2061_v32, %s1975_s13  ;;  %308 = vrot.lane.b32.xlu1 %v2075_v43, %s1974_s12 }
  0xb5   : > { %639 = vrot.lane.b32.xlu0 %v2059_v31, %s1976_s14  ;;  %581 = vrot.lane.b32.xlu1 %v2069_v35, %s1975_s13 }
  0xb9   : > { %643 = vrot.lane.b32.xlu0 %v2061_v32, %s1976_s14  ;;  %585 = vrot.lane.b32.xlu1 %v2075_v43, %s1975_s13 }
  0xbd   : > { %699 = vrot.lane.b32.xlu0 %v2059_v31, %s1977_s15  ;;  %641 = vrot.lane.b32.xlu1 %v2069_v35, %s1976_s14 }
  0xc1   : > { %703 = vrot.lane.b32.xlu0 %v2061_v32, %s1977_s15  ;;  %645 = vrot.lane.b32.xlu1 %v2075_v43, %s1976_s14  ;;  %s1986_s14 = smov 119  }
  0xc5   : > { %531 = vrot.lane.b32.xlu0 %v2059_v31, %s1978_s16  ;;  %701 = vrot.lane.b32.xlu1 %v2069_v35, %s1977_s15 }
  0xc9   : > { %535 = vrot.lane.b32.xlu0 %v2061_v32, %s1978_s16  ;;  %705 = vrot.lane.b32.xlu1 %v2075_v43, %s1977_s15 }
  0xcd   : > { %807 = vrot.lane.b32.xlu0 %v2059_v31, %s1979_s17  ;;  %533 = vrot.lane.b32.xlu1 %v2069_v35, %s1978_s16 }
  0xd1   : > { %811 = vrot.lane.b32.xlu0 %v2061_v32, %s1979_s17  ;;  %537 = vrot.lane.b32.xlu1 %v2075_v43, %s1978_s16  ;;  %s1931_s16 = sshll.u32 %s2794_s22, 5 }
  0xd5   : > { %867 = vrot.lane.b32.xlu0 %v2059_v31, %s1980_s18  ;;  %809 = vrot.lane.b32.xlu1 %v2069_v35, %s1979_s17 }
  0xd9   : > { %871 = vrot.lane.b32.xlu0 %v2061_v32, %s1980_s18  ;;  %813 = vrot.lane.b32.xlu1 %v2075_v43, %s1979_s17 }
  0xdd   : > { %927 = vrot.lane.b32.xlu0 %v2059_v31, %s1981_s19  ;;  %869 = vrot.lane.b32.xlu1 %v2069_v35, %s1980_s18 }
  0xe1   : > { %931 = vrot.lane.b32.xlu0 %v2061_v32, %s1981_s19  ;;  %873 = vrot.lane.b32.xlu1 %v2075_v43, %s1980_s18 }
  0xe5   : > { %759 = vrot.lane.b32.xlu0 %v2059_v31, %s1982_s20  ;;  %929 = vrot.lane.b32.xlu1 %v2069_v35, %s1981_s19 }
  0xe9   : > { %763 = vrot.lane.b32.xlu0 %v2061_v32, %s1982_s20  ;;  %933 = vrot.lane.b32.xlu1 %v2075_v43, %s1981_s19  ;;  %s1987_s19 = smov 120  }
  0xed   : > { %1086 = vrot.lane.b32.xlu0 %v2059_v31, %s1983_s23  ;;  %761 = vrot.lane.b32.xlu1 %v2069_v35, %s1982_s20 }
  0xf1   : > { %1090 = vrot.lane.b32.xlu0 %v2061_v32, %s1983_s23  ;;  %765 = vrot.lane.b32.xlu1 %v2075_v43, %s1982_s20 }
  0xf5   : > { %1146 = vrot.lane.b32.xlu0 %v2059_v31, %s1984_s24  ;;  %1088 = vrot.lane.b32.xlu1 %v2069_v35, %s1983_s23 }
  0xf9   : > { %1150 = vrot.lane.b32.xlu0 %v2061_v32, %s1984_s24  ;;  %1092 = vrot.lane.b32.xlu1 %v2075_v43, %s1983_s23 }
  0xfd   : > { %987 = vrot.lane.b32.xlu0 %v2059_v31, %s1985_s25  ;;  %1148 = vrot.lane.b32.xlu1 %v2069_v35, %s1984_s24 }
 0x101   : > { %991 = vrot.lane.b32.xlu0 %v2061_v32, %s1985_s25  ;;  %1152 = vrot.lane.b32.xlu1 %v2075_v43, %s1984_s24 }
 0x103   : > { %v356_v53 = vpop.permute.xlu0 %355  ;;  %v352_v54 = vpop.permute.xlu1 %351 }
 0x105   : > { %1254 = vrot.lane.b32.xlu0 %v2059_v31, %s1986_s14  ;;  %989 = vrot.lane.b32.xlu1 %v2069_v35, %s1985_s25 }
 0x107   : > { %v2204_v8 = vpop.permute.xlu0 %411  ;;  %v354_v9 = vpop.permute.xlu1 %353 }
 0x108   : > { %v361_v19 = vsel %vm359_vm0, %v354_v9, %v356_v53  ;;  %v362_v20 = vsel %vm359_vm0, %v352_v54, %v354_v9 }
 0x109   : > { %v388_v23 = vmul.f32 %v374_v51, %v362_v20  ;;  %v389_v24 = vmul.f32 %v378_v55, %v361_v19  ;;  %v1384_v25 = vmul.f32 %v1367_v56, %v362_v20  ;;  %v1385_v26 = vmul.f32 %v1371_v57, %v361_v19  ;;  %1258 = vrot.lane.b32.xlu0 %v2061_v32, %s1986_s14 }
 0x10a   : > { %993 = vrot.lane.b32.xlu1 %v2075_v43, %s1985_s25 }
 0x10b   : > { %v392_v34 = vpack.c.bf16 %v388_v23, %v388_v23  ;;  %v393_v36 = vpack.c.bf16 %v389_v24, %v389_v24  ;;  %v1388_v37 = vpack.c.bf16 %v1384_v25, %v1384_v25  ;;  %v1389_v38 = vpack.c.bf16 %v1385_v26, %v1385_v26  ;;  %v416_v39 = vpop.permute.xlu0 %415  ;;  %v358_v40 = vpop.permute.xlu1 %357 }
 0x10c   : > { %v360_v41 = vsel %vm359_vm0, %v356_v53, %v358_v40  ;;  %v363_v42 = vsel %vm359_vm0, %v358_v40, %v352_v54  ;;  %v2260_v54 = vld [vmem:[%s2789_s3 + $0x5] ss:$8 sm:$0xf]  ;;  %vm1214_vm0 = vcmp.lt.s32.totalorder %v2141_v49, 120 }
 0x10d   : > { %v400_v46 = vrot.slane %v392_v34, 6  ;;  %v401_v47 = vrot.slane %v393_v36, 6  ;;  %v1396_v48 = vrot.slane %v1388_v37, 2  ;;  %v1397_v51 = vrot.slane %v1389_v38, 2  ;;  %1206 = vrot.lane.b32.xlu0 %v2059_v31, %s1987_s19 }
 0x10e   : > { %v387_v55 = vmul.f32 %v370_v58, %v363_v42  ;;  %v390_v56 = vmul.f32 %v382_v59, %v360_v41  ;;  %v1386_v53 = vmul.f32 %v1375_v60, %v360_v41  ;;  %v1387_v57 = vmul.f32 %v1379_v61, %v363_v42  ;;  %1256 = vrot.lane.b32.xlu1 %v2069_v35, %s1986_s14  ;;  %v2286_v37 = vld [vmem:[%s2789_s3 + $0x47] ss:$8 sm:$0xf] }
 0x10f   : > { %408 = vst [vmem:[#allocation2 + $0x8] sm:$0xc] %v400_v46  ;;  %409 = vst [vmem:[#allocation2 + $0x10] sm:$0xc] %v401_v47  ;;  %v2262_v9 = vpop.permute.xlu0 %471  ;;  %v414_v31 = vpop.permute.xlu1 %413  ;;  %v322_v58 = vrot.slane %v2217_v18, %v2044_v10  ;;  %v334_v59 = vrot.slane %v2217_v18, %v2050_v13  ;;  %v1328_v60 = vrot.slane %v2232_v27, %v2048_v12 }
 0x110   : > { %1404 = vst [vmem:[#allocation2 + $0x80] sm:$0xc0] %v1396_v48  ;;  %1405 = vst [vmem:[#allocation2 + $0x88] sm:$0xc0] %v1397_v51  ;;  %v1332_v61 = vrot.slane %v2232_v27, %v2050_v13  ;;  %v391_v19 = vpack.c.bf16 %v387_v55, %v387_v55  ;;  %v394_v20 = vpack.c.bf16 %v390_v56, %v390_v56 }
 0x111   : > { %v1390_v23 = vpack.c.bf16 %v1386_v53, %v1386_v53  ;;  %v1391_v24 = vpack.c.bf16 %v1387_v57, %v1387_v57  ;;  %v421_v25 = vsel %vm419_vm1, %v414_v31, %v416_v39  ;;  %v422_v26 = vsel %vm419_vm1, %v2204_v8, %v414_v31  ;;  %1210 = vrot.lane.b32.xlu0 %v2061_v32, %s1987_s19  ;;  %v1746_v32 = vld [vmem:[%s2791_s5] sm:$0xff] }
 0x112   : > { %v602_v34 = vrot.slane %v2260_v54, %v2046_v11  ;;  %v606_v36 = vrot.slane %v2260_v54, %v2048_v12  ;;  %v399_v38 = vrot.slane %v391_v19, 6  ;;  %v402_v40 = vrot.slane %v394_v20, 6  ;;  %1260 = vrot.lane.b32.xlu1 %v2075_v43, %s1986_s14  ;;  %v2440_v27 = vld [vmem:[%s2789_s3 + $0x7] ss:$8 sm:$0xf] }
 0x113   : > { %v1398_v41 = vrot.slane %v1390_v23, 2  ;;  %v1399_v42 = vrot.slane %v1391_v24, 2  ;;  %v448_v46 = vmul.f32 %v434_v62, %v422_v26  ;;  %v449_v47 = vmul.f32 %v438_v1, %v421_v25  ;;  %v476_v55 = vpop.permute.xlu0 %475  ;;  %v418_v56 = vpop.permute.xlu1 %417 }
 0x114   : > { %v1431_v48 = vmul.f32 %v1414_v2, %v422_v26  ;;  %v1432_v51 = vmul.f32 %v1418_v3, %v421_v25  ;;  %407 = vst [vmem:[#allocation2] sm:$0xc] %v399_v38  ;;  %410 = vst [vmem:[#allocation2 + $0x18] sm:$0xc] %v402_v40  ;;  %v420_v62 = vsel %vm419_vm1, %v416_v39, %v418_v56 }
 0x115   : > { %1406 = vst [vmem:[#allocation2 + $0x90] sm:$0xc0] %v1398_v41  ;;  %1407 = vst [vmem:[#allocation2 + $0x98] sm:$0xc0] %v1399_v42  ;;  %v423_v1 = vsel %vm419_vm1, %v418_v56, %v2204_v8  ;;  %v1543_v2 = vrot.slane %v2286_v37, %v2044_v10  ;;  %v1547_v53 = vrot.slane %v2286_v37, %v2046_v11  ;;  %1749 = vperm.xlu0 %1959, %v1746_v32  }
 0x116   : > { %v452_v3 = vpack.c.bf16 %v448_v46, %v448_v46  ;;  %v453_v57 = vpack.c.bf16 %v449_v47, %v449_v47  ;;  %v1435_v31 = vpack.c.bf16 %v1431_v48, %v1431_v48  ;;  %v1436_v19 = vpack.c.bf16 %v1432_v51, %v1432_v51  ;;  %1208 = vrot.lane.b32.xlu1 %v2069_v35, %s1987_s19  ;;  %v2338_v35 = vld [vmem:[%s2789_s3 + $0x6] ss:$8 sm:$0xf] }
 0x117   : > { %v447_v39 = vmul.f32 %v430_v4, %v423_v1  ;;  %v450_v8 = vmul.f32 %v442_v5, %v420_v62  ;;  %v1433_v20 = vmul.f32 %v1422_v6, %v420_v62  ;;  %v1434_v23 = vmul.f32 %v1426_v7, %v423_v1  ;;  %v2329_v4 = vpop.permute.xlu0 %302  ;;  %v474_v26 = vpop.permute.xlu1 %473 }
 0x118   : > { %v460_v24 = vrot.slane %v452_v3, 4  ;;  %v461_v25 = vrot.slane %v453_v57, 4  ;;  %1439 = vst [vmem:[#allocation2 + $0xa0] sm:$0x3] %v1435_v31  ;;  %1440 = vst [vmem:[#allocation2 + $0xa8] sm:$0x3] %v1436_v19  ;;  %v598_v50 = vrot.slane %v2260_v54, %v2044_v10  ;;  %v610_v5 = vrot.slane %v2260_v54, %v2050_v13 }
 0x119   : > { %v451_v6 = vpack.c.bf16 %v447_v39, %v447_v39  ;;  %v454_v38 = vpack.c.bf16 %v450_v8, %v450_v8  ;;  %v1437_v52 = vpack.c.bf16 %v1433_v20, %v1433_v20  ;;  %v1438_v7 = vpack.c.bf16 %v1434_v23, %v1434_v23 }
 0x11a   : > { %468 = vst [vmem:[#allocation2 + $0x8] sm:$0x30] %v460_v24  ;;  %469 = vst [vmem:[#allocation2 + $0x10] sm:$0x30] %v461_v25  ;;  %v481_v40 = vsel %vm479_vm2, %v474_v26, %v476_v55  ;;  %v482_v41 = vsel %vm479_vm2, %v2262_v9, %v474_v26  ;;  %v1551_v42 = vrot.slane %v2286_v37, %v2048_v12  ;;  %1212 = vrot.lane.b32.xlu1 %v2075_v43, %s1987_s19  ;;  %s251_s19 = scalar_lea.vmem %s2792_s6, %s1931_s16 }
 0x11b   : > { %v1555_v32 = vrot.slane %v2286_v37, %v2050_v13  ;;  %v459_v46 = vrot.slane %v451_v6, 4  ;;  %v462_v47 = vrot.slane %v454_v38, 4  ;;  %1441 = vst [vmem:[#allocation2 + $0xb0] sm:$0x3] %v1437_v52  ;;  %1442 = vst [vmem:[#allocation2 + $0xb8] sm:$0x3] %v1438_v7  ;;  %v508_v48 = vmul.f32 %v494_v14, %v482_v41  ;;  %v307_v1 = vpop.permute.xlu0 %306  ;;  %v478_v3 = vpop.permute.xlu1 %477 }
 0x11c   : > { %v509_v51 = vmul.f32 %v498_v15, %v481_v40  ;;  %v1466_v56 = vmul.f32 %v1449_v16, %v482_v41  ;;  %v1467_v62 = vmul.f32 %v1453_v17, %v481_v40  ;;  %v662_v14 = vrot.slane %v2338_v35, %v2046_v11 }
 0x11d   : > { %v666_v57 = vrot.slane %v2338_v35, %v2048_v12  ;;  %467 = vst [vmem:[#allocation2] sm:$0x30] %v459_v46  ;;  %470 = vst [vmem:[#allocation2 + $0x18] sm:$0x30] %v462_v47  ;;  %v512_v15 = vpack.c.bf16 %v508_v48, %v508_v48  ;;  %v480_v31 = vsel %vm479_vm2, %v476_v55, %v478_v3 }
 0x11e   : > { %v513_v43 = vpack.c.bf16 %v509_v51, %v509_v51  ;;  %v483_v16 = vsel %vm479_vm2, %v478_v3, %v2262_v9  ;;  %v1470_v17 = vpack.c.bf16 %v1466_v56, %v1466_v56  ;;  %v1471_v19 = vpack.c.bf16 %v1467_v62, %v1467_v62 }
 0x11f   : > { %v507_v39 = vmul.f32 %v490_v21, %v483_v16  ;;  %v510_v8 = vmul.f32 %v502_v22, %v480_v31  ;;  %v520_v20 = vrot.slane %v512_v15, 2  ;;  %v1468_v55 = vmul.f32 %v1457_v28, %v480_v31  ;;  %v2385_v6 = vpop.permute.xlu0 %579  ;;  %v305_v63 = vpop.permute.xlu1 %304 }
 0x120   : > { %v521_v23 = vrot.slane %v513_v43, 2  ;;  %v1469_v9 = vmul.f32 %v1461_v29, %v483_v16  ;;  %v1478_v24 = vrot.slane %v1470_v17, 6  ;;  %v1479_v25 = vrot.slane %v1471_v19, 6 }
 0x121   : > { %v511_v26 = vpack.c.bf16 %v507_v39, %v507_v39  ;;  %v514_v21 = vpack.c.bf16 %v510_v8, %v510_v8  ;;  %528 = vst [vmem:[#allocation2 + $0x8] sm:$0xc0] %v520_v20  ;;  %v1472_v22 = vpack.c.bf16 %v1468_v55, %v1468_v55  ;;  %v314_v52 = vsel %vm312_vm3, %v305_v63, %v307_v1 }
 0x122   : > { %529 = vst [vmem:[#allocation2 + $0x10] sm:$0xc0] %v521_v23  ;;  %v1473_v38 = vpack.c.bf16 %v1469_v9, %v1469_v9  ;;  %v315_v28 = vsel %vm312_vm3, %v2329_v4, %v305_v63  ;;  %1486 = vst [vmem:[#allocation2 + $0xa0] sm:$0xc] %v1478_v24  ;;  %v341_v41 = vmul.f32 %v330_v33, %v314_v52 }
 0x123   : > { %1487 = vst [vmem:[#allocation2 + $0xa8] sm:$0xc] %v1479_v25  ;;  %v519_v29 = vrot.slane %v511_v26, 2  ;;  %v522_v7 = vrot.slane %v514_v21, 2  ;;  %v340_v40 = vmul.f32 %v326_v30, %v315_v28  ;;  %v1480_v46 = vrot.slane %v1472_v22, 6  ;;  %v584_v3 = vpop.permute.xlu0 %583  ;;  %v309_v30 = vpop.permute.xlu1 %308 }
 0x124   : > { %v1481_v47 = vrot.slane %v1473_v38, 6  ;;  %v1337_v48 = vmul.f32 %v1320_v44, %v315_v28  ;;  %v1338_v51 = vmul.f32 %v1324_v45, %v314_v52  ;;  %v345_v62 = vpack.c.bf16 %v341_v41, %v341_v41  ;;  %v2454_v26 = vld [vmem:[%s2789_s3 + $0x61] ss:$8 sm:$0xf] }
 0x125   : > { %527 = vst [vmem:[#allocation2] sm:$0xc0] %v519_v29  ;;  %530 = vst [vmem:[#allocation2 + $0x18] sm:$0xc0] %v522_v7  ;;  %v344_v56 = vpack.c.bf16 %v340_v40, %v340_v40  ;;  %v1590_v15 = vrot.slane %v2395_v0, %v2044_v10  ;;  %v1594_v33 = vrot.slane %v2395_v0, %v2046_v11 }
 0x126   : > { %1488 = vst [vmem:[#allocation2 + $0xb0] sm:$0xc] %v1480_v46  ;;  %1489 = vst [vmem:[#allocation2 + $0xb8] sm:$0xc] %v1481_v47  ;;  %v1341_v43 = vpack.c.bf16 %v1337_v48, %v1337_v48  ;;  %v1342_v44 = vpack.c.bf16 %v1338_v51, %v1338_v51  ;;  %v313_v31 = vsel %vm312_vm3, %v307_v1, %v309_v30 }
 0x127   : > { %v316_v45 = vsel %vm312_vm3, %v309_v30, %v2329_v4  ;;  %348 = vst [vmem:[#allocation2 + $0x8] sm:$0x3] %v344_v56  ;;  %349 = vst [vmem:[#allocation2 + $0x10] sm:$0x3] %v345_v62  ;;  %v342_v17 = vmul.f32 %v334_v59, %v313_v31  ;;  %v1339_v19 = vmul.f32 %v1328_v60, %v313_v31  ;;  %v2435_v55 = vpop.permute.xlu0 %639  ;;  %v582_v60 = vpop.permute.xlu1 %581 }
 0x128   : > { %v339_v16 = vmul.f32 %v322_v58, %v316_v45  ;;  %v1340_v1 = vmul.f32 %v1332_v61, %v316_v45  ;;  %v1349_v4 = vrot.slane %v1341_v43, 4  ;;  %v1350_v39 = vrot.slane %v1342_v44, 4 }
 0x129   : > { %v658_v8 = vrot.slane %v2338_v35, %v2044_v10  ;;  %v670_v58 = vrot.slane %v2338_v35, %v2050_v13  ;;  %v346_v59 = vpack.c.bf16 %v342_v17, %v342_v17  ;;  %v1343_v20 = vpack.c.bf16 %v1339_v19, %v1339_v19 }
 0x12a   : > { %v343_v18 = vpack.c.bf16 %v339_v16, %v339_v16  ;;  %v1344_v23 = vpack.c.bf16 %v1340_v1, %v1340_v1  ;;  %1357 = vst [vmem:[#allocation2 + $0x80] sm:$0x30] %v1349_v4  ;;  %1358 = vst [vmem:[#allocation2 + $0x88] sm:$0x30] %v1350_v39  ;;  %v589_v61 = vsel %vm587_vm4, %v582_v60, %v584_v3 }
 0x12b   : > { %v590_v9 = vsel %vm587_vm4, %v2385_v6, %v582_v60  ;;  %v1598_v24 = vrot.slane %v2395_v0, %v2048_v12  ;;  %v1602_v25 = vrot.slane %v2395_v0, %v2050_v13  ;;  %350 = vst [vmem:[#allocation2 + $0x18] sm:$0x3] %v346_v59  ;;  %v1351_v21 = vrot.slane %v1343_v20, 4  ;;  %v644_v41 = vpop.permute.xlu0 %643 }
 0x12c   : > { %347 = vst [vmem:[#allocation2] sm:$0x3] %v343_v18  ;;  %v1352_v63 = vrot.slane %v1344_v23, 4  ;;  %v616_v22 = vmul.f32 %v602_v34, %v590_v9  ;;  %v617_v38 = vmul.f32 %v606_v36, %v589_v61  ;;  %v1560_v52 = vmul.f32 %v1543_v2, %v590_v9  ;;  %v586_v36 = vpop.permute.xlu1 %585 }
 0x12d   : > { %v1561_v28 = vmul.f32 %v1547_v53, %v589_v61  ;;  %v722_v29 = vrot.slane %v2440_v27, %v2046_v11  ;;  %v726_v7 = vrot.slane %v2440_v27, %v2048_v12  ;;  %1359 = vst [vmem:[#allocation2 + $0x90] sm:$0x30] %v1351_v21  ;;  %v1625_v46 = vrot.slane %v2454_v26, %v2044_v10 }
 0x12e   : > { %1360 = vst [vmem:[#allocation2 + $0x98] sm:$0x30] %v1352_v63  ;;  %v620_v34 = vpack.c.bf16 %v616_v22, %v616_v22  ;;  %v621_v40 = vpack.c.bf16 %v617_v38, %v617_v38  ;;  %v1629_v2 = vrot.slane %v2454_v26, %v2046_v11  ;;  %v1564_v47 = vpack.c.bf16 %v1560_v52, %v1560_v52  ;;  %v1715_v56 = vld [vmem:[#allocation2 + $0x8] sm:$0xff]  ;;  %v1716_v60 = vld [vmem:[#allocation2 + $0x10] sm:$0xff] }
 0x12f   : > { %v1565_v53 = vpack.c.bf16 %v1561_v28, %v1561_v28  ;;  %v588_v48 = vsel %vm587_vm4, %v584_v3, %v586_v36  ;;  %v591_v51 = vsel %vm587_vm4, %v586_v36, %v2385_v6  ;;  %1752 = vmatprep.subr.bf16.mxu0 %v1715_v56  ;;  %v2494_v17 = vpop.permute.xlu0 %699  ;;  %v730_v19 = vrot.slane %v2440_v27, %v2050_v13 }
 0x130   : > { %v628_v62 = vrot.slane %v620_v34, 6  ;;  %v629_v30 = vrot.slane %v621_v40, 6  ;;  %v615_v43 = vmul.f32 %v598_v50, %v591_v51  ;;  %v618_v44 = vmul.f32 %v610_v5, %v588_v48  ;;  %v642_v54 = vpop.permute.xlu1 %641 }
 0x131   : > { %v1572_v31 = vrot.slane %v1564_v47, 2  ;;  %v1573_v3 = vrot.slane %v1565_v53, 2  ;;  %v1562_v6 = vmul.f32 %v1551_v42, %v588_v48  ;;  %v1563_v45 = vmul.f32 %v1555_v32, %v591_v51  ;;  %v2534_v47 = vld [vmem:[%s2789_s3 + $0x46] ss:$8 sm:$0xf] }
 0x132   : > { %636 = vst [vmem:[#allocation2 + $0x28] sm:$0xc] %v628_v62  ;;  %637 = vst [vmem:[#allocation2 + $0x30] sm:$0xc] %v629_v30  ;;  %v619_v50 = vpack.c.bf16 %v615_v43, %v615_v43  ;;  %v622_v16 = vpack.c.bf16 %v618_v44, %v618_v44  ;;  %v718_v5 = vrot.slane %v2440_v27, %v2044_v10  ;;  %v1717_v39 = vld [vmem:[#allocation2 + $0x18] sm:$0xff] }
 0x133   : > { %1580 = vst [vmem:[#allocation2 + $0xa0] sm:$0xc0] %v1572_v31  ;;  %1581 = vst [vmem:[#allocation2 + $0xa8] sm:$0xc0] %v1573_v3  ;;  %v1566_v42 = vpack.c.bf16 %v1562_v6, %v1562_v6  ;;  %v1567_v1 = vpack.c.bf16 %v1563_v45, %v1563_v45  ;;  %v649_v37 = vsel %vm647_vm5, %v642_v54, %v644_v41  ;;  %v1714_v4 = vld [vmem:[#allocation2] sm:$0xff]  ;;  %1793 = vmatprep.subr.bf16.mxu1 %v1717_v39  ;;  %v704_v38 = vpop.permute.xlu0 %703 }
 0x134   : > { %v650_v32 = vsel %vm647_vm5, %v2435_v55, %v642_v54  ;;  %v627_v18 = vrot.slane %v619_v50, 6  ;;  %v630_v59 = vrot.slane %v622_v16, 6  ;;  %v677_v23 = vmul.f32 %v666_v57, %v649_v37  ;;  %1753 = vmatpush1.bf16.msra.mxu0 %v1714_v4  ;;  %1794 = vmatpush1.bf16.msra.mxu1 %v1716_v60  ;;  %v646_v57 = vpop.permute.xlu1 %645 }
 0x135   : > { %v676_v20 = vmul.f32 %v662_v14, %v650_v32  ;;  %v1574_v61 = vrot.slane %v1566_v42, 2  ;;  %v1575_v9 = vrot.slane %v1567_v1, 2  ;;  %v1607_v21 = vmul.f32 %v1590_v15, %v650_v32  ;;  %v2524_v15 = vld [vmem:[%s2789_s3 + $0x4] ss:$8 sm:$0xf] }
 0x136   : > { %v1608_v63 = vmul.f32 %v1594_v33, %v649_v37  ;;  %635 = vst [vmem:[#allocation2 + $0x20] sm:$0xc] %v627_v18  ;;  %638 = vst [vmem:[#allocation2 + $0x38] sm:$0xc] %v630_v59  ;;  %v681_v22 = vpack.c.bf16 %v677_v23, %v677_v23  ;;  %v1633_v52 = vrot.slane %v2454_v26, %v2048_v12 }
 0x137   : > { %v680_v14 = vpack.c.bf16 %v676_v20, %v676_v20  ;;  %v1637_v28 = vrot.slane %v2454_v26, %v2050_v13  ;;  %1582 = vst [vmem:[#allocation2 + $0xb0] sm:$0xc0] %v1574_v61  ;;  %1583 = vst [vmem:[#allocation2 + $0xb8] sm:$0xc0] %v1575_v9  ;;  %v1611_v33 = vpack.c.bf16 %v1607_v21, %v1607_v21 }
 0x138   : > { %v1612_v34 = vpack.c.bf16 %v1608_v63, %v1608_v63  ;;  %v648_v40 = vsel %vm647_vm5, %v644_v41, %v646_v57  ;;  %v651_v36 = vsel %vm647_vm5, %v646_v57, %v2435_v55  ;;  %v689_v48 = vrot.slane %v681_v22, 4  ;;  %v702_v30 = vpop.permute.xlu1 %701 }
 0x139   : > { %v688_v53 = vrot.slane %v680_v14, 4  ;;  %v675_v51 = vmul.f32 %v658_v8, %v651_v36  ;;  %v678_v56 = vmul.f32 %v670_v58, %v648_v40  ;;  %1615 = vst [vmem:[#allocation2 + $0xc0] sm:$0x3] %v1611_v33  ;;  %v1609_v55 = vmul.f32 %v1598_v24, %v648_v40  ;;  %v2551_v58 = vpop.permute.xlu0 %531 }
 0x13a   : > { %1616 = vst [vmem:[#allocation2 + $0xc8] sm:$0x3] %v1612_v34  ;;  %v1610_v41 = vmul.f32 %v1602_v25, %v651_v36  ;;  %v554_v62 = vrot.slane %v2524_v15, %v2046_v11  ;;  %697 = vst [vmem:[#allocation2 + $0x30] sm:$0x30] %v689_v48  ;;  %v558_v43 = vrot.slane %v2524_v15, %v2048_v12 }
 0x13b   : > { %696 = vst [vmem:[#allocation2 + $0x28] sm:$0x30] %v688_v53  ;;  %v679_v8 = vpack.c.bf16 %v675_v51, %v675_v51  ;;  %v682_v35 = vpack.c.bf16 %v678_v56, %v678_v56  ;;  %v1496_v24 = vrot.slane %v2534_v47, %v2044_v10  ;;  %v1613_v0 = vpack.c.bf16 %v1609_v55, %v1609_v55 }
 0x13c   : > { %v1614_v25 = vpack.c.bf16 %v1610_v41, %v1610_v41  ;;  %v709_v44 = vsel %vm707_vm6, %v702_v30, %v704_v38  ;;  %v710_v31 = vsel %vm707_vm6, %v2494_v17, %v702_v30  ;;  %v1500_v42 = vrot.slane %v2534_v47, %v2046_v11  ;;  %v706_v32 = vpop.permute.xlu1 %705 }
 0x13d   : > { %v687_v3 = vrot.slane %v679_v8, 4  ;;  %v690_v6 = vrot.slane %v682_v35, 4  ;;  %v736_v45 = vmul.f32 %v722_v29, %v710_v31  ;;  %v737_v50 = vmul.f32 %v726_v7, %v709_v44  ;;  %1617 = vst [vmem:[#allocation2 + $0xd0] sm:$0x3] %v1613_v0  ;;  %v536_v37 = vpop.permute.xlu0 %535 }
 0x13e   : > { %1618 = vst [vmem:[#allocation2 + $0xd8] sm:$0x3] %v1614_v25  ;;  %v1642_v16 = vmul.f32 %v1625_v46, %v710_v31  ;;  %v1643_v54 = vmul.f32 %v1629_v2, %v709_v44  ;;  %v550_v29 = vrot.slane %v2524_v15, %v2044_v10  ;;  %v562_v4 = vrot.slane %v2524_v15, %v2050_v13 }
 0x13f   : > { %695 = vst [vmem:[#allocation2 + $0x20] sm:$0x30] %v687_v3  ;;  %698 = vst [vmem:[#allocation2 + $0x38] sm:$0x30] %v690_v6  ;;  %v740_v1 = vpack.c.bf16 %v736_v45, %v736_v45  ;;  %v741_v7 = vpack.c.bf16 %v737_v50, %v737_v50  ;;  %v1504_v46 = vrot.slane %v2534_v47, %v2048_v12 }
 0x140   : > { %v1646_v26 = vpack.c.bf16 %v1642_v16, %v1642_v16  ;;  %v1647_v2 = vpack.c.bf16 %v1643_v54, %v1643_v54  ;;  %v708_v39 = vsel %vm707_vm6, %v704_v38, %v706_v32  ;;  %v711_v18 = vsel %vm707_vm6, %v706_v32, %v2494_v17  ;;  %v534_v17 = vpop.permute.xlu1 %533 }
 0x141   : > { %v748_v59 = vrot.slane %v740_v1, 2  ;;  %v749_v20 = vrot.slane %v741_v7, 2  ;;  %v735_v23 = vmul.f32 %v718_v5, %v711_v18  ;;  %v738_v60 = vmul.f32 %v730_v19, %v708_v39  ;;  %v2593_v38 = vpop.permute.xlu0 %807 }
 0x142   : > { %v1654_v61 = vrot.slane %v1646_v26, 6  ;;  %v1655_v9 = vrot.slane %v1647_v2, 6  ;;  %v1644_v21 = vmul.f32 %v1633_v52, %v708_v39  ;;  %v1645_v63 = vmul.f32 %v1637_v28, %v711_v18  ;;  %v2606_v28 = vld [vmem:[%s2789_s3 + $0x21] ss:$8 sm:$0xf] }
 0x143   : > { %756 = vst [vmem:[#allocation2 + $0x28] sm:$0xc0] %v748_v59  ;;  %757 = vst [vmem:[#allocation2 + $0x30] sm:$0xc0] %v749_v20  ;;  %v739_v14 = vpack.c.bf16 %v735_v23, %v735_v23  ;;  %v742_v22 = vpack.c.bf16 %v738_v60, %v738_v60  ;;  %v1508_v57 = vrot.slane %v2534_v47, %v2050_v13 }
 0x144   : > { %1662 = vst [vmem:[#allocation2 + $0xc0] sm:$0xc] %v1654_v61  ;;  %1663 = vst [vmem:[#allocation2 + $0xc8] sm:$0xc] %v1655_v9  ;;  %v1648_v27 = vpack.c.bf16 %v1644_v21, %v1644_v21  ;;  %v1649_v5 = vpack.c.bf16 %v1645_v63, %v1645_v63  ;;  %v541_v19 = vsel %vm539_vm7, %v534_v17, %v536_v37  ;;  %v538_v41 = vpop.permute.xlu1 %537 }
 0x145   : > { %v542_v52 = vsel %vm539_vm7, %v2551_v58, %v534_v17  ;;  %v747_v15 = vrot.slane %v739_v14, 2  ;;  %v750_v33 = vrot.slane %v742_v22, 2  ;;  %v569_v40 = vmul.f32 %v558_v43, %v541_v19  ;;  %v812_v55 = vpop.permute.xlu0 %811  ;;  %v1911_v2 = vld [vmem:[%s2789_s3 + $0x22] ss:$8 sm:$0xf] }
 0x146   : > { %v568_v34 = vmul.f32 %v554_v62, %v542_v52  ;;  %v1656_v36 = vrot.slane %v1648_v27, 6  ;;  %v1657_v47 = vrot.slane %v1649_v5, 6  ;;  %v1513_v53 = vmul.f32 %v1496_v24, %v542_v52 }
 0x147   : > { %v1514_v48 = vmul.f32 %v1500_v42, %v541_v19  ;;  %755 = vst [vmem:[#allocation2 + $0x20] sm:$0xc0] %v747_v15  ;;  %758 = vst [vmem:[#allocation2 + $0x38] sm:$0xc0] %v750_v33  ;;  %v573_v56 = vpack.c.bf16 %v569_v40, %v569_v40  ;;  %v830_v8 = vrot.slane %v2606_v28, %v2046_v11 }
 0x148   : > { %v572_v51 = vpack.c.bf16 %v568_v34, %v568_v34  ;;  %v834_v35 = vrot.slane %v2606_v28, %v2048_v12  ;;  %1664 = vst [vmem:[#allocation2 + $0xd0] sm:$0xc] %v1656_v36  ;;  %1665 = vst [vmem:[#allocation2 + $0xd8] sm:$0xc] %v1657_v47  ;;  %v1517_v62 = vpack.c.bf16 %v1513_v53, %v1513_v53  ;;  %v810_v1 = vpop.permute.xlu1 %809 }
 0x149   : > { %v1518_v30 = vpack.c.bf16 %v1514_v48, %v1514_v48  ;;  %v540_v43 = vsel %vm539_vm7, %v536_v37, %v538_v41  ;;  %v543_v24 = vsel %vm539_vm7, %v538_v41, %v2551_v58  ;;  %577 = vst [vmem:[#allocation2 + $0x30] sm:$0x3] %v573_v56  ;;  %v868_v42 = vpop.permute.xlu0 %867  ;;  %v817_v7 = vsel %vm815_vm8, %v810_v1, %v812_v55 }
 0x14a   : > { %576 = vst [vmem:[#allocation2 + $0x28] sm:$0x3] %v572_v51  ;;  %v567_v0 = vmul.f32 %v550_v29, %v543_v24  ;;  %v570_v25 = vmul.f32 %v562_v4, %v540_v43  ;;  %v1515_v44 = vmul.f32 %v1504_v46, %v540_v43  ;;  %v1516_v31 = vmul.f32 %v1508_v57, %v543_v24  ;;  %v1912_v51 = vld [vmem:[%s2789_s3 + $0x23] ss:$8 sm:$0xf] }
 0x14b   : > { %v1525_v3 = vrot.slane %v1517_v62, 4  ;;  %v1526_v6 = vrot.slane %v1518_v30, 4  ;;  %v818_v58 = vsel %vm815_vm8, %v2593_v38, %v810_v1  ;;  %v826_v29 = vrot.slane %v2606_v28, %v2044_v10 }
 0x14c   : > { %v571_v45 = vpack.c.bf16 %v567_v0, %v567_v0  ;;  %v574_v50 = vpack.c.bf16 %v570_v25, %v570_v25  ;;  %v1519_v16 = vpack.c.bf16 %v1515_v44, %v1515_v44  ;;  %v1520_v54 = vpack.c.bf16 %v1516_v31, %v1516_v31  ;;  %v814_v20 = vpop.permute.xlu1 %813 }
 0x14d   : > { %1533 = vst [vmem:[#allocation2 + $0xa0] sm:$0x30] %v1525_v3  ;;  %1534 = vst [vmem:[#allocation2 + $0xa8] sm:$0x30] %v1526_v6  ;;  %v838_v37 = vrot.slane %v2606_v28, %v2050_v13  ;;  %v844_v46 = vmul.f32 %v830_v8, %v818_v58  ;;  %v845_v26 = vmul.f32 %v834_v35, %v817_v7  ;;  %v872_v59 = vpop.permute.xlu0 %871 }
 0x14e   : > { %575 = vst [vmem:[#allocation2 + $0x20] sm:$0x3] %v571_v45  ;;  %578 = vst [vmem:[#allocation2 + $0x38] sm:$0x3] %v574_v50  ;;  %v1527_v32 = vrot.slane %v1519_v16, 4  ;;  %v1528_v4 = vrot.slane %v1520_v54, 4  ;;  %v816_v23 = vsel %vm815_vm8, %v812_v55, %v814_v20  ;;  %v819_v60 = vsel %vm815_vm8, %v814_v20, %v2593_v38 }
 0x14f   : > { %v848_v39 = vpack.c.bf16 %v844_v46, %v844_v46  ;;  %v849_v18 = vpack.c.bf16 %v845_v26, %v845_v26  ;;  %v890_v9 = vrot.slane %v1911_v2, %v2046_v11  ;;  %v894_v21 = vrot.slane %v1911_v2, %v2048_v12 }
 0x150   : > { %1535 = vst [vmem:[#allocation2 + $0xb0] sm:$0x30] %v1527_v32  ;;  %1536 = vst [vmem:[#allocation2 + $0xb8] sm:$0x30] %v1528_v4  ;;  %v843_v22 = vmul.f32 %v826_v29, %v819_v60  ;;  %v846_v17 = vmul.f32 %v838_v37, %v816_v23  ;;  %v870_v19 = vpop.permute.xlu1 %869  ;;  %v886_v33 = vrot.slane %v1911_v2, %v2044_v10  ;;  %v1720_v48 = vld [vmem:[#allocation2 + $0x30] sm:$0xff] }
 0x151   : > { %v1719_v61 = vld [vmem:[#allocation2 + $0x28] sm:$0xff]  ;;  %v856_v63 = vrot.slane %v848_v39, 6  ;;  %v857_v14 = vrot.slane %v849_v18, 6  ;;  %v928_v5 = vpop.permute.xlu0 %927  ;;  %v877_v52 = vsel %vm875_vm9, %v870_v19, %v872_v59  ;;  %v878_v38 = vsel %vm875_vm9, %v868_v42, %v870_v19 }
 0x152   : > { %1754 = vmatprep.subr.bf16.mxu0 %v1719_v61  ;;  %v847_v57 = vpack.c.bf16 %v843_v22, %v843_v22  ;;  %v850_v27 = vpack.c.bf16 %v846_v17, %v846_v17  ;;  %v898_v34 = vrot.slane %v1911_v2, %v2050_v13  ;;  %v904_v47 = vmul.f32 %v890_v9, %v878_v38  ;;  %v1909_v37 = vld [vmem:[%s2789_s3 + $0x20] ss:$8 sm:$0xf]  ;;  %v1927_v2 = vld [vmem:[%s2789_s3 + $0x62] ss:$8 sm:$0xf] }
 0x153   : > { %864 = vst [vmem:[#allocation2 + $0x48] sm:$0xc] %v856_v63  ;;  %865 = vst [vmem:[#allocation2 + $0x50] sm:$0xc] %v857_v14  ;;  %v905_v53 = vmul.f32 %v894_v21, %v877_v52  ;;  %v950_v30 = vrot.slane %v1912_v51, %v2046_v11  ;;  %v954_v43 = vrot.slane %v1912_v51, %v2048_v12 }
 0x154   : > { %v855_v40 = vrot.slane %v847_v57, 6  ;;  %v858_v36 = vrot.slane %v850_v27, 6  ;;  %v908_v56 = vpack.c.bf16 %v904_v47, %v904_v47  ;;  %v874_v8 = vpop.permute.xlu1 %873  ;;  %v946_v54 = vrot.slane %v1912_v51, %v2044_v10 }
 0x155   : > { %v1718_v28 = vld [vmem:[#allocation2 + $0x20] sm:$0xff]  ;;  %v1721_v15 = vld [vmem:[#allocation2 + $0x38] sm:$0xff]  ;;  %v909_v55 = vpack.c.bf16 %v905_v53, %v905_v53  ;;  %v932_v41 = vpop.permute.xlu0 %931  ;;  %v876_v35 = vsel %vm875_vm9, %v872_v59, %v874_v8  ;;  %v879_v62 = vsel %vm875_vm9, %v874_v8, %v868_v42  ;;  %v958_v42 = vrot.slane %v1912_v51, %v2050_v13 }
 0x156   : > { %1755 = vmatpush1.bf16.msra.mxu0 %v1718_v28  ;;  %1795 = vmatprep.subr.bf16.mxu1 %v1721_v15  ;;  %863 = vst [vmem:[#allocation2 + $0x40] sm:$0xc] %v855_v40  ;;  %866 = vst [vmem:[#allocation2 + $0x58] sm:$0xc] %v858_v36  ;;  %v916_v24 = vrot.slane %v908_v56, 4  ;;  %v903_v25 = vmul.f32 %v886_v33, %v879_v62  ;;  %v906_v44 = vmul.f32 %v898_v34, %v876_v35 }
 0x157   : > { %1796 = vmatpush1.bf16.msra.mxu1 %v1720_v48  ;;  %v917_v0 = vrot.slane %v909_v55, 4  ;;  %v782_v59 = vrot.slane %v1909_v37, %v2046_v11  ;;  %v786_v20 = vrot.slane %v1909_v37, %v2048_v12  ;;  %v1672_v21 = vrot.slane %v1927_v2, %v2044_v10  ;;  %v2687_v15 = vld [vmem:[%s2789_s3 + $0x26] ss:$8 sm:$0xf] }
 0x158   : > { %924 = vst [vmem:[#allocation2 + $0x48] sm:$0x30] %v916_v24  ;;  %v907_v31 = vpack.c.bf16 %v903_v25, %v903_v25  ;;  %v910_v3 = vpack.c.bf16 %v906_v44, %v906_v44  ;;  %v930_v45 = vpop.permute.xlu1 %929  ;;  %v1676_v63 = vrot.slane %v1927_v2, %v2046_v11  ;;  %v778_v27 = vrot.slane %v1909_v37, %v2044_v10 }
 0x159   : > { %925 = vst [vmem:[#allocation2 + $0x50] sm:$0x30] %v917_v0  ;;  %v760_v6 = vpop.permute.xlu0 %759  ;;  %v937_v50 = vsel %vm935_vm10, %v930_v45, %v932_v41  ;;  %v938_v16 = vsel %vm935_vm10, %v928_v5, %v930_v45  ;;  %v1680_v38 = vrot.slane %v1927_v2, %v2048_v12  ;;  %v1684_v28 = vrot.slane %v1927_v2, %v2050_v13 }
 0x15a   : > { %v915_v1 = vrot.slane %v907_v31, 4  ;;  %v918_v7 = vrot.slane %v910_v3, 4  ;;  %v964_v58 = vmul.f32 %v950_v30, %v938_v16  ;;  %v965_v29 = vmul.f32 %v954_v43, %v937_v50 }
 0x15b   : > { %v1109_v8 = vrot.slane %v2687_v15, %v2046_v11 }
 0x15c   : > { %923 = vst [vmem:[#allocation2 + $0x40] sm:$0x30] %v915_v1  ;;  %926 = vst [vmem:[#allocation2 + $0x58] sm:$0x30] %v918_v7  ;;  %v968_v32 = vpack.c.bf16 %v964_v58, %v964_v58  ;;  %v969_v4 = vpack.c.bf16 %v965_v29, %v965_v29  ;;  %v934_v26 = vpop.permute.xlu1 %933  ;;  %v1113_v58 = vrot.slane %v2687_v15, %v2048_v12 }
 0x15d   : > { %v764_v46 = vpop.permute.xlu0 %763  ;;  %v936_v39 = vsel %vm935_vm10, %v932_v41, %v934_v26  ;;  %v939_v18 = vsel %vm935_vm10, %v934_v26, %v928_v5  ;;  %v790_v5 = vrot.slane %v1909_v37, %v2050_v13  ;;  %v1105_v41 = vrot.slane %v2687_v15, %v2044_v10  ;;  %v1916_v26 = vld [vmem:[%s2789_s3 + $0x27] ss:$8 sm:$0xf] }
 0x15e   : > { %v976_v23 = vrot.slane %v968_v32, 2  ;;  %v977_v60 = vrot.slane %v969_v4, 2  ;;  %v963_v61 = vmul.f32 %v946_v54, %v939_v18  ;;  %v966_v9 = vmul.f32 %v958_v42, %v936_v39 }
 0x15f   : > { %v1117_v29 = vrot.slane %v2687_v15, %v2050_v13  ;;  %v1173_v15 = vrot.slane %v1916_v26, %v2048_v12 }
 0x160   : > { %984 = vst [vmem:[#allocation2 + $0x48] sm:$0xc0] %v976_v23  ;;  %985 = vst [vmem:[#allocation2 + $0x50] sm:$0xc0] %v977_v60  ;;  %v967_v14 = vpack.c.bf16 %v963_v61, %v963_v61  ;;  %v970_v22 = vpack.c.bf16 %v966_v9, %v966_v9  ;;  %v762_v57 = vpop.permute.xlu1 %761  ;;  %v1165_v61 = vrot.slane %v1916_v26, %v2044_v10 }
 0x161   : > { %v2674_v17 = vpop.permute.xlu0 %1086  ;;  %v769_v19 = vsel %vm767_vm11, %v762_v57, %v764_v46  ;;  %v770_v52 = vsel %vm767_vm11, %v760_v6, %v762_v57  ;;  %v1169_v9 = vrot.slane %v1916_v26, %v2046_v11 }
 0x162   : > { %v975_v33 = vrot.slane %v967_v14, 2  ;;  %v978_v34 = vrot.slane %v970_v22, 2  ;;  %v796_v40 = vmul.f32 %v782_v59, %v770_v52  ;;  %v797_v36 = vmul.f32 %v786_v20, %v769_v19 }
 0x163   : > { %v1689_v47 = vmul.f32 %v1672_v21, %v770_v52  ;;  %v1690_v53 = vmul.f32 %v1676_v63, %v769_v19 }
 0x164   : > { %983 = vst [vmem:[#allocation2 + $0x40] sm:$0xc0] %v975_v33  ;;  %986 = vst [vmem:[#allocation2 + $0x58] sm:$0xc0] %v978_v34  ;;  %v800_v48 = vpack.c.bf16 %v796_v40, %v796_v40  ;;  %v801_v51 = vpack.c.bf16 %v797_v36, %v797_v36  ;;  %v766_v55 = vpop.permute.xlu1 %765  ;;  %v1177_v33 = vrot.slane %v1916_v26, %v2050_v13 }
 0x165   : > { %v1091_v56 = vpop.permute.xlu0 %1090  ;;  %v1693_v35 = vpack.c.bf16 %v1689_v47, %v1689_v47  ;;  %v1694_v62 = vpack.c.bf16 %v1690_v53, %v1690_v53  ;;  %v768_v30 = vsel %vm767_vm11, %v764_v46, %v766_v55  ;;  %v771_v43 = vsel %vm767_vm11, %v766_v55, %v760_v6 }
 0x166   : > { %804 = vst [vmem:[#allocation2 + $0x48] sm:$0x3] %v800_v48  ;;  %805 = vst [vmem:[#allocation2 + $0x50] sm:$0x3] %v801_v51  ;;  %v795_v24 = vmul.f32 %v778_v27, %v771_v43  ;;  %v798_v0 = vmul.f32 %v790_v5, %v768_v30  ;;  %v1691_v25 = vmul.f32 %v1680_v38, %v768_v30 }
 0x167   : > { %v1692_v44 = vmul.f32 %v1684_v28, %v771_v43  ;;  %v1701_v31 = vrot.slane %v1693_v35, 4  ;;  %v1702_v3 = vrot.slane %v1694_v62, 4  ;;  %v1913_v48 = vld [vmem:[%s2789_s3 + $0x24] ss:$8 sm:$0xf] }
 0x168   : > { %v799_v45 = vpack.c.bf16 %v795_v24, %v795_v24  ;;  %v802_v50 = vpack.c.bf16 %v798_v0, %v798_v0  ;;  %v1695_v16 = vpack.c.bf16 %v1691_v25, %v1691_v25  ;;  %v1089_v1 = vpop.permute.xlu1 %1088  ;;  %v1010_v62 = vrot.slane %v1913_v48, %v2046_v11 }
 0x169   : > { %v1696_v54 = vpack.c.bf16 %v1692_v44, %v1692_v44  ;;  %v1147_v42 = vpop.permute.xlu0 %1146  ;;  %1709 = vst [vmem:[#allocation2 + $0xc0] sm:$0x30] %v1701_v31  ;;  %1710 = vst [vmem:[#allocation2 + $0xc8] sm:$0x30] %v1702_v3  ;;  %v1096_v7 = vsel %vm1094_vm12, %v1089_v1, %v1091_v56  ;;  %v1097_v6 = vsel %vm1094_vm12, %v2674_v17, %v1089_v1 }
 0x16a   : > { %803 = vst [vmem:[#allocation2 + $0x40] sm:$0x3] %v799_v45  ;;  %806 = vst [vmem:[#allocation2 + $0x58] sm:$0x3] %v802_v50  ;;  %v1703_v37 = vrot.slane %v1695_v16, 4  ;;  %v1122_v4 = vmul.f32 %v1105_v41, %v1097_v6  ;;  %v1123_v46 = vmul.f32 %v1109_v8, %v1096_v7  ;;  %v1014_v30 = vrot.slane %v1913_v48, %v2048_v12 }
 0x16b   : > { %v1704_v32 = vrot.slane %v1696_v54, 4  ;;  %v1006_v6 = vrot.slane %v1913_v48, %v2044_v10 }
 0x16c   : > { %1711 = vst [vmem:[#allocation2 + $0xd0] sm:$0x30] %v1703_v37  ;;  %v1126_v2 = vpack.c.bf16 %v1122_v4, %v1122_v4  ;;  %v1127_v39 = vpack.c.bf16 %v1123_v46, %v1123_v46  ;;  %v1093_v59 = vpop.permute.xlu1 %1092 }
 0x16d   : > { %1712 = vst [vmem:[#allocation2 + $0xd8] sm:$0x30] %v1704_v32  ;;  %v1151_v18 = vpop.permute.xlu0 %1150  ;;  %v1095_v20 = vsel %vm1094_vm12, %v1091_v56, %v1093_v59  ;;  %v1098_v23 = vsel %vm1094_vm12, %v1093_v59, %v2674_v17  ;;  %v1723_v60 = vld [vmem:[#allocation2 + $0x48] sm:$0xff]  ;;  %v1724_v53 = vld [vmem:[#allocation2 + $0x50] sm:$0xff] }
 0x16e   : > { %v1134_v21 = vrot.slane %v1126_v2, 4  ;;  %v1135_v63 = vrot.slane %v1127_v39, 4  ;;  %v1124_v14 = vmul.f32 %v1113_v58, %v1095_v20  ;;  %v1125_v22 = vmul.f32 %v1117_v29, %v1098_v23  ;;  %1756 = vmatprep.subr.bf16.mxu0 %v1723_v60  ;;  %v1918_v32 = vld [vmem:[%s2789_s3 + $0x41] ss:$8 sm:$0xf] }
 0x16f   : > { %v1018_v58 = vrot.slane %v1913_v48, %v2050_v13  ;;  %v1273_v59 = vrot.slane %v1918_v32, %v2044_v10  ;;  %v1277_v20 = vrot.slane %v1918_v32, %v2046_v11 }
 0x170   : > { %1142 = vst [vmem:[#allocation2 + $0x60] sm:$0x30] %v1134_v21  ;;  %1143 = vst [vmem:[#allocation2 + $0x68] sm:$0x30] %v1135_v63  ;;  %v1128_v57 = vpack.c.bf16 %v1124_v14, %v1124_v14  ;;  %v1129_v27 = vpack.c.bf16 %v1125_v22, %v1125_v22  ;;  %v1149_v19 = vpop.permute.xlu1 %1148  ;;  %v1739_v49 = vld [vmem:[#allocation2 + $0xc8] sm:$0xff] }
 0x171   : > { %v988_v5 = vpop.permute.xlu0 %987  ;;  %v1156_v52 = vsel %vm1154_vm13, %v1149_v19, %v1151_v18  ;;  %v1157_v17 = vsel %vm1154_vm13, %v1147_v42, %v1149_v19  ;;  %v1722_v38 = vld [vmem:[#allocation2 + $0x40] sm:$0xff]  ;;  %v1725_v28 = vld [vmem:[#allocation2 + $0x58] sm:$0xff] }
 0x172   : > { %v1136_v34 = vrot.slane %v1128_v57, 4  ;;  %v1137_v40 = vrot.slane %v1129_v27, 4  ;;  %v1182_v36 = vmul.f32 %v1165_v61, %v1157_v17  ;;  %v1183_v47 = vmul.f32 %v1169_v9, %v1156_v52  ;;  %1757 = vmatpush1.bf16.msra.mxu0 %v1722_v38  ;;  %1797 = vmatprep.subr.bf16.mxu1 %v1725_v28 }
 0x173   : > { %1798 = vmatpush1.bf16.msra.mxu1 %v1724_v53  ;;  %v1281_v57 = vrot.slane %v1918_v32, %v2048_v12  ;;  %v1285_v27 = vrot.slane %v1918_v32, %v2050_v13  ;;  %v1738_v32 = vld [vmem:[#allocation2 + $0xc0] sm:$0xff] }
 0x174   : > { %1144 = vst [vmem:[#allocation2 + $0x70] sm:$0x30] %v1136_v34  ;;  %1145 = vst [vmem:[#allocation2 + $0x78] sm:$0x30] %v1137_v40  ;;  %v1186_v51 = vpack.c.bf16 %v1182_v36, %v1182_v36  ;;  %v1187_v56 = vpack.c.bf16 %v1183_v47, %v1183_v47  ;;  %v1153_v41 = vpop.permute.xlu1 %1152 }
 0x175   : > { %v992_v55 = vpop.permute.xlu0 %991  ;;  %v1155_v8 = vsel %vm1154_vm13, %v1151_v18, %v1153_v41  ;;  %v1158_v35 = vsel %vm1154_vm13, %v1153_v41, %v1147_v42 }
 0x176   : > { %v1194_v43 = vrot.slane %v1186_v51, 2  ;;  %v1195_v24 = vrot.slane %v1187_v56, 2  ;;  %v1184_v0 = vmul.f32 %v1173_v15, %v1155_v8  ;;  %v1185_v25 = vmul.f32 %v1177_v33, %v1158_v35 }
 0x178   : > { %1202 = vst [vmem:[#allocation2 + $0x60] sm:$0xc0] %v1194_v43  ;;  %1203 = vst [vmem:[#allocation2 + $0x68] sm:$0xc0] %v1195_v24  ;;  %v1188_v44 = vpack.c.bf16 %v1184_v0, %v1184_v0  ;;  %v1189_v31 = vpack.c.bf16 %v1185_v25, %v1185_v25  ;;  %v990_v45 = vpop.permute.xlu1 %989 }
 0x179   : > { %v1255_v3 = vpop.permute.xlu0 %1254  ;;  %v997_v50 = vsel %vm995_vm14, %v990_v45, %v992_v55  ;;  %v998_v16 = vsel %vm995_vm14, %v988_v5, %v990_v45 }
 0x17a   : > { %v1196_v54 = vrot.slane %v1188_v44, 2  ;;  %v1197_v42 = vrot.slane %v1189_v31, 2  ;;  %v1024_v1 = vmul.f32 %v1010_v62, %v998_v16  ;;  %v1025_v7 = vmul.f32 %v1014_v30, %v997_v50 }
 0x17c   : > { %1204 = vst [vmem:[#allocation2 + $0x70] sm:$0xc0] %v1196_v54  ;;  %1205 = vst [vmem:[#allocation2 + $0x78] sm:$0xc0] %v1197_v42  ;;  %v1028_v29 = vpack.c.bf16 %v1024_v1, %v1024_v1  ;;  %v1029_v37 = vpack.c.bf16 %v1025_v7, %v1025_v7  ;;  %v994_v46 = vpop.permute.xlu1 %993  ;;  %v1735_v7 = vld [vmem:[#allocation2 + $0xa8] sm:$0xff] }
 0x17d   : > { %v1259_v4 = vpop.permute.xlu0 %1258  ;;  %v996_v26 = vsel %vm995_vm14, %v992_v55, %v994_v46  ;;  %v999_v2 = vsel %vm995_vm14, %v994_v46, %v988_v5  ;;  %v1917_v5 = vld [vmem:[%s2789_s3 + $0x40] ss:$8 sm:$0xf] }
 0x17e   : > { %1032 = vst [vmem:[#allocation2 + $0x68] sm:$0x3] %v1028_v29  ;;  %1033 = vst [vmem:[#allocation2 + $0x70] sm:$0x3] %v1029_v37  ;;  %v1023_v39 = vmul.f32 %v1006_v6, %v999_v2  ;;  %v1026_v18 = vmul.f32 %v1018_v58, %v996_v26  ;;  %v1225_v33 = vrot.slane %v1917_v5, %v2044_v10  ;;  %v1734_v29 = vld [vmem:[#allocation2 + $0xa0] sm:$0xff]  ;;  %v1737_v37 = vld [vmem:[#allocation2 + $0xb8] sm:$0xff] }
 0x17f   : > { %v1229_v34 = vrot.slane %v1917_v5, %v2046_v11  ;;  %v1233_v11 = vrot.slane %v1917_v5, %v2048_v12  ;;  %v1237_v62 = vrot.slane %v1917_v5, %v2050_v13  ;;  %v1741_v46 = vld [vmem:[#allocation2 + $0xd8] sm:$0xff]  ;;  %v1960_v26 = vld [vmem:[#allocation2 + $0xe0] sm:$0xff]  ;;  %v1740_v2 = vld [vmem:[#allocation2 + $0xd0] sm:$0xff] }
 0x180   : > { %v1027_v23 = vpack.c.bf16 %v1023_v39, %v1023_v39  ;;  %v1030_v60 = vpack.c.bf16 %v1026_v18, %v1026_v18  ;;  %v1257_v61 = vpop.permute.xlu1 %1256  ;;  %v1713_v39 = vld [vmem:[%s2790_s4] sm:$0xf] }
 0x181   : > { %v1264_v9 = vsel %vm1262_vm15, %v1257_v61, %v1259_v4  ;;  %v1265_v21 = vsel %vm1262_vm15, %v1255_v3, %v1257_v61  ;;  %v1207_v63 = vpop.permute.xlu0 %1206 }
 0x182   : > { %1031 = vst [vmem:[#allocation2 + $0x60] sm:$0x3] %v1027_v23  ;;  %1034 = vst [vmem:[#allocation2 + $0x78] sm:$0x3] %v1030_v60  ;;  %v1290_v14 = vmul.f32 %v1273_v59, %v1265_v21  ;;  %v1291_v22 = vmul.f32 %v1277_v20, %v1264_v9 }
 0x184   : > { %v1294_v19 = vpack.c.bf16 %v1290_v14, %v1290_v14  ;;  %v1295_v52 = vpack.c.bf16 %v1291_v22, %v1291_v22  ;;  %v1261_v17 = vpop.permute.xlu1 %1260 }
 0x185   : > { %v1727_v38 = vld [vmem:[#allocation2 + $0x68] sm:$0xff]  ;;  %v1263_v28 = vsel %vm1262_vm15, %v1259_v4, %v1261_v17  ;;  %v1266_v15 = vsel %vm1262_vm15, %v1261_v17, %v1255_v3  ;;  %v1211_v48 = vpop.permute.xlu0 %1210  ;;  %v1728_v25 = vld [vmem:[#allocation2 + $0x70] sm:$0xff] }
 0x186   : > { %1758 = vmatprep.subr.bf16.mxu0 %v1727_v38  ;;  %v1302_v40 = vrot.slane %v1294_v19, 6  ;;  %v1303_v36 = vrot.slane %v1295_v52, 6  ;;  %v1292_v47 = vmul.f32 %v1281_v57, %v1263_v28  ;;  %v1293_v53 = vmul.f32 %v1285_v27, %v1266_v15  ;;  %v1736_v4 = vld [vmem:[#allocation2 + $0xb0] sm:$0xff] }
 0x188   : > { %1310 = vst [vmem:[#allocation2 + $0x80] sm:$0xc] %v1302_v40  ;;  %1311 = vst [vmem:[#allocation2 + $0x88] sm:$0xc] %v1303_v36  ;;  %v1296_v51 = vpack.c.bf16 %v1292_v47, %v1292_v47  ;;  %v1297_v56 = vpack.c.bf16 %v1293_v53, %v1293_v53  ;;  %v1209_v55 = vpop.permute.xlu1 %1208 }
 0x189   : > { %v1216_v41 = vsel %vm1214_vm0, %v1209_v55, %v1211_v48  ;;  %v1217_v8 = vsel %vm1214_vm0, %v1207_v63, %v1209_v55  ;;  %v1726_v35 = vld [vmem:[#allocation2 + $0x60] sm:$0xff]  ;;  %v1729_v10 = vld [vmem:[#allocation2 + $0x78] sm:$0xff] }
 0x18a   : > { %v1304_v30 = vrot.slane %v1296_v51, 6  ;;  %v1305_v43 = vrot.slane %v1297_v56, 6  ;;  %v1242_v24 = vmul.f32 %v1225_v33, %v1217_v8  ;;  %v1243_v0 = vmul.f32 %v1229_v34, %v1216_v41  ;;  %1759 = vmatpush1.bf16.msra.mxu0 %v1726_v35  ;;  %1799 = vmatprep.subr.bf16.mxu1 %v1729_v10 }
 0x18b   : > { %1800 = vmatpush1.bf16.msra.mxu1 %v1728_v25 }
 0x18c   : > { %1312 = vst [vmem:[#allocation2 + $0x90] sm:$0xc] %v1304_v30  ;;  %1313 = vst [vmem:[#allocation2 + $0x98] sm:$0xc] %v1305_v43  ;;  %v1246_v44 = vpack.c.bf16 %v1242_v24, %v1242_v24  ;;  %v1247_v31 = vpack.c.bf16 %v1243_v0, %v1243_v0  ;;  %v1213_v3 = vpop.permute.xlu1 %1212 }
 0x18d   : > { %v1215_v45 = vsel %vm1214_vm0, %v1211_v48, %v1213_v3  ;;  %v1218_v12 = vsel %vm1214_vm0, %v1213_v3, %v1207_v63 }
 0x18e   : > { %1250 = vst [vmem:[#allocation2 + $0x80] sm:$0x3] %v1246_v44  ;;  %1251 = vst [vmem:[#allocation2 + $0x88] sm:$0x3] %v1247_v31  ;;  %v1244_v13 = vmul.f32 %v1233_v11, %v1215_v45  ;;  %v1245_v50 = vmul.f32 %v1237_v62, %v1218_v12 }
 0x190   : > { %v1248_v16 = vpack.c.bf16 %v1244_v13, %v1244_v13  ;;  %v1249_v54 = vpack.c.bf16 %v1245_v50, %v1245_v50 }
 0x192   : > { %1252 = vst [vmem:[#allocation2 + $0x90] sm:$0x3] %v1248_v16  ;;  %1253 = vst [vmem:[#allocation2 + $0x98] sm:$0x3] %v1249_v54 }
 0x194   : > { %v1750_v18 = vpop.permute.xlu0 %1749 }
 0x195   : > { %v1731_v42 = vld [vmem:[#allocation2 + $0x88] sm:$0xff]  ;;  %v1730_v1 = vld [vmem:[#allocation2 + $0x80] sm:$0xff] }
 0x196   : > { %1760 = vmatprep.subr.bf16.mxu0 %v1731_v42 }
 0x197   : > { %1761 = vmatpush1.bf16.msra.mxu0 %v1730_v1 }
 0x198   : > { %1762 = vmatprep.subr.bf16.mxu0 %v1735_v7 }
 0x199   : > { %v1733_v6 = vld [vmem:[#allocation2 + $0x98] sm:$0xff]  ;;  %v1732_v58 = vld [vmem:[#allocation2 + $0x90] sm:$0xff] }
 0x19a   : > { %1801 = vmatprep.subr.bf16.mxu1 %v1733_v6 }
 0x19b   : > { %1763 = vmatpush1.bf16.msra.mxu0 %v1734_v29  ;;  %1802 = vmatpush1.bf16.msra.mxu1 %v1732_v58 }
 0x19c   : > { %1764 = vmatprep.subr.bf16.mxu0 %v1739_v49  ;;  %1803 = vmatprep.subr.bf16.mxu1 %v1737_v37 }
 0x19f   : > { %1765 = vmatpush1.bf16.msra.mxu0 %v1738_v32  ;;  %1804 = vmatpush1.bf16.msra.mxu1 %v1736_v4 }
 0x1a0   : > { %1805 = vmatprep.subr.bf16.mxu1 %v1741_v46  ;;  %1766 = vmatprep.subr.bf16.mxu0 %v1960_v26 }
 0x1a3   : > { %1767 = vmatpush1.bf16.msra.mxu0 %v1960_v26  ;;  %1806 = vmatpush1.bf16.msra.mxu1 %v1740_v2 }
 0x1a4   : > { %1807 = vmatprep.subr.bf16.mxu1 %v1960_v26 }
 0x1a6   : > { %1785 = vmatmul.mubr.bf16.vlgmr.msra.gmra.mrb[0].mxu0 %v1713_v39 }
 0x1a7   : > { %1808 = vmatpush1.bf16.msra.mxu1 %v1960_v26 }
 0x1aa   : > { %1826 = vmatmul.mubr.bf16.vlgmr.msra.gmra.mrb[0].mxu1 %v1713_v39 }
 0x279   : > { %v1786_v59 = vpop.f32.mrb[0].mxu0 }
 0x27a   : > { %v1787_v20 = vadd.f32 %v1786_v59, %v1750_v18  ;;  %v1788_v23 = vpop.f32.mrb[1].mxu0 }
 0x27b   : > { %v1789_v60 = vadd.f32 %v1788_v23, %v1750_v18  ;;  %v1790_v61 = vpop.f32.mrb[2].mxu0 }
 0x27c   : > { %1834 = vst [vmem:[%s251_s19] sm:$0xff] %v1787_v20  ;;  %v1791_v9 = vpop.f32.mrb[3].mxu0 }
 0x27d   : > { %1835 = vst [vmem:[%s251_s19 + $0x8] sm:$0xff] %v1789_v60  ;;  %v1827_v21 = vpop.f32.mrb[0].mxu1 }
 0x27e   : > { %v1828_v63 = vadd.f32 %v1827_v21, %v1750_v18  ;;  %v1829_v14 = vpop.f32.mrb[1].mxu1 }
 0x27f   : > { %v1830_v22 = vadd.f32 %v1829_v14, %v1750_v18  ;;  %v1831_v57 = vpop.f32.mrb[2].mxu1 }
 0x280   : > { %1836 = vst [vmem:[%s251_s19 + $0x10] sm:$0xff] %v1828_v63  ;;  %v1832_v27 = vpop.f32.mrb[3].mxu1 }
 0x281   : > { %1837 = vst [vmem:[%s251_s19 + $0x18] sm:$0xff] %v1830_v22 }
 0x282 PF: > { %s16_s21 = sadd.s32 1, %s1967_s21  }
 0x283   : > { %p13_p4 = scmp.ge.s32.totalorder %s16_s21, 4  }
 0x285   :  { %15 = sbr.rel (!%p13_p4) target bundleno = 1 (0x1), region = 100 }

</bundles_post_ra>
